<compile_context>
chip_gen: v5e
topology: v5e:2x2
jax: 0.10.0
libtpu: 0.0.40
codegen_flags: <defaults>
</compile_context>

<pallas_src>
import functools
import math

import jax
import jax.numpy as jnp
from jax.experimental import pallas as pl
from jax.experimental.pallas import tpu as pltpu


# ---------------------------------------------------------------------------
# Tiled matmul kernels (f32 VMEM accumulator, fused bias / relu epilogue)
# ---------------------------------------------------------------------------
def _matmul_kernel(a_ref, b_ref, o_ref, acc_ref, *, relu):
    @pl.when(pl.program_id(2) == 0)
    def _():
        acc_ref[...] = jnp.zeros_like(acc_ref)

    acc_ref[...] += jnp.dot(a_ref[...], b_ref[...],
                            preferred_element_type=jnp.float32)

    @pl.when(pl.program_id(2) == pl.num_programs(2) - 1)
    def _():
        acc = acc_ref[...]
        if relu:
            acc = jnp.maximum(acc, 0.0)
        o_ref[...] = acc.astype(o_ref.dtype)


def _matmul_bias_kernel(a_ref, b_ref, bias_ref, o_ref, acc_ref, *, relu):
    @pl.when(pl.program_id(2) == 0)
    def _():
        acc_ref[...] = jnp.zeros_like(acc_ref)

    acc_ref[...] += jnp.dot(a_ref[...], b_ref[...],
                            preferred_element_type=jnp.float32)

    @pl.when(pl.program_id(2) == pl.num_programs(2) - 1)
    def _():
        acc = acc_ref[...] + bias_ref[...]   # bias is (1, tn) f32, broadcasts
        if relu:
            acc = jnp.maximum(acc, 0.0)
        o_ref[...] = acc.astype(o_ref.dtype)


def _pick_tile(dim, preferred):
    """Largest power-of-two tile <= preferred that divides dim (>= 128)."""
    t = preferred
    while t > 128 and dim % t != 0:
        t //= 2
    return min(t, dim)


def pallas_matmul(a, b, bias=None, relu=False, out_dtype=jnp.bfloat16,
                  tm_pref=256, tn_pref=256, tk_pref=512):
    """out = [relu](a @ b [+ bias]); a/b are bf16 tiles, accumulation is f32.

    Shapes must already be padded to multiples of 128 (the 128-base tiles are
    also friendly to v5e's 4x128^2 MXU; v6e/v7x get 256/512 tiles when the
    dims allow).
    """
    m, k = a.shape
    k2, n = b.shape
    assert k == k2, (a.shape, b.shape)

    tm = _pick_tile(m, tm_pref)
    tn = _pick_tile(n, tn_pref)
    tk = _pick_tile(k, tk_pref)
    grid = (m // tm, n // tn, k // tk)

    bytes_accessed = (m * k * a.dtype.itemsize
                      + k * n * b.dtype.itemsize
                      + m * n * jnp.dtype(out_dtype).itemsize)
    if bias is not None:
        bytes_accessed += n * bias.dtype.itemsize
    cost = pl.CostEstimate(flops=2 * m * n * k, transcendentals=0,
                           bytes_accessed=bytes_accessed)

    in_specs = [
        pl.BlockSpec((tm, tk), lambda i, j, kk: (i, kk)),
        pl.BlockSpec((tk, tn), lambda i, j, kk: (kk, j)),
    ]
    if bias is None:
        kernel = functools.partial(_matmul_kernel, relu=relu)
        operands = (a, b)
    else:
        kernel = functools.partial(_matmul_bias_kernel, relu=relu)
        in_specs.append(pl.BlockSpec((1, tn), lambda i, j, kk: (0, j)))
        operands = (a, b, bias)

    return pl.pallas_call(
        kernel,
        out_shape=jax.ShapeDtypeStruct((m, n), out_dtype),
        grid=grid,
        in_specs=in_specs,
        out_specs=pl.BlockSpec((tm, tn), lambda i, j, kk: (i, j)),
        scratch_shapes=[pltpu.VMEM((tm, tn), jnp.float32)],
        compiler_params=pltpu.CompilerParams(
            dimension_semantics=("parallel", "parallel", "arbitrary")),
        cost_estimate=cost,
    )(*operands)


# ---------------------------------------------------------------------------
# GCNClusterP forward (cluster=False): 3 GNN layers + Linear + relu
# ---------------------------------------------------------------------------
def _round_up(d, m=128):
    return ((d + m - 1) // m) * m


def _pad2(x, shape):
    pads = [(0, s - d) for d, s in zip(x.shape, shape)]
    if all(p == (0, 0) for p in pads):
        return x
    return jnp.pad(x, pads)


def gcn_cluster_forward(x, adj, w1, w2, w3, w_out, b_out):
    """Fused-per-matmul GCNClusterP forward; returns z_l of shape [N, out_dim]."""
    n, in_dim = x.shape
    out_dim = w_out.shape[1]

    n_p = _round_up(n)
    in_p = _round_up(in_dim)
    h1_p = _round_up(w1.shape[1])
    h2_p = _round_up(w2.shape[1])
    h3_p = _round_up(w3.shape[1])
    out_p = _round_up(out_dim)

    # Zero-pad to lane/MXU friendly multiples of 128 and cast operands to
    # bf16 (f32 accumulation happens inside the kernels).  Zero padding keeps
    # all padded lanes/rows exactly zero through matmul + relu.
    bf = jnp.bfloat16
    xp = _pad2(x, (n_p, in_p)).astype(bf)
    adjp = _pad2(adj, (n_p, n_p)).astype(bf)
    w1p = _pad2(w1, (in_p, h1_p)).astype(bf)
    w2p = _pad2(w2, (h1_p, h2_p)).astype(bf)
    w3p = _pad2(w3, (h2_p, h3_p)).astype(bf)
    wop = _pad2(w_out, (h3_p, out_p)).astype(bf)
    bop = _pad2(b_out.reshape(1, -1), (1, out_p)).astype(jnp.float32)

    # Layer 1: relu(adj @ (x @ W1))      (F.dropout is identity in eval mode)
    s = pallas_matmul(xp, w1p)
    h = pallas_matmul(adjp, s, relu=True)
    # Layer 2
    s = pallas_matmul(h, w2p)
    h = pallas_matmul(adjp, s, relu=True)
    # Layer 3
    s = pallas_matmul(h, w3p)
    h = pallas_matmul(adjp, s, relu=True)
    # Output Linear + relu (bias fused in the epilogue, f32 output)
    z = pallas_matmul(h, wop, bias=bop, relu=True, out_dtype=jnp.float32)

    return z[:n, :out_dim]


# ---------------------------------------------------------------------------
# References & demo
# ---------------------------------------------------------------------------
def xavier_uniform(key, fan_in, fan_out):
    bound = math.sqrt(6.0 / (fan_in + fan_out))
    return jax.random.uniform(key, (fan_in, fan_out), jnp.float32,
                              minval=-bound, maxval=bound)


def reference_forward_f32(x, adj, w1, w2, w3, w_out, b_out):
    h = jax.nn.relu(adj @ (x @ w1))
    h = jax.nn.relu(adj @ (h @ w2))
    h = jax.nn.relu(adj @ (h @ w3))
    return jax.nn.relu(h @ w_out + b_out[None, :])


def reference_forward_bf16(x, adj, w1, w2, w3, w_out, b_out):
    """Emulates the kernel's mixed precision (bf16 operands, f32 accumulate)."""
    bf = jnp.bfloat16

    def mm(a, b):
        return jnp.dot(a.astype(bf), b.astype(bf),
                       preferred_element_type=jnp.float32)

    s = mm(x, w1).astype(bf)
    h = jnp.maximum(mm(adj, s), 0.0).astype(bf)
    s = mm(h, w2).astype(bf)
    h = jnp.maximum(mm(adj, s), 0.0).astype(bf)
    s = mm(h, w3).astype(bf)
    h = jnp.maximum(mm(adj, s), 0.0).astype(bf)
    return jnp.maximum(mm(h, w_out) + b_out[None, :].astype(jnp.float32), 0.0)


if __name__ == "__main__":
    # Small, deterministic example shapes (hidden dims fixed by GCNClusterP).
    N = 16          # number of graph nodes
    IN_DIM = 32     # input feature dim
    OUT_DIM = 64    # GCNClusterP out_dim
    HIDDEN = [200, 300, 200]

    key = jax.random.PRNGKey(0)
    k_x, k_adj, k1, k2, k3, k4, k5 = jax.random.split(key, 7)

    x = jax.random.normal(k_x, (N, IN_DIM), jnp.float32)

    # Symmetric, row-normalized dense adjacency (torch.spmm seen densely).
    a_raw = jax.random.uniform(k_adj, (N, N), jnp.float32)
    a_sym = (a_raw + a_raw.T) * 0.5 + jnp.eye(N, dtype=jnp.float32)
    adj = a_sym / jnp.sum(a_sym, axis=1, keepdims=True)

    # Parameter init (xavier uniform for GNN weights, uniform for Linear).
    w1 = xavier_uniform(k1, IN_DIM, HIDDEN[0])
    w2 = xavier_uniform(k2, HIDDEN[0], HIDDEN[1])
    w3 = xavier_uniform(k3, HIDDEN[1], HIDDEN[2])
    lin_bound = 1.0 / math.sqrt(HIDDEN[2])
    # nn.Linear stores weight as [out, in]; pre-transposed to [in, out] here.
    w_out = jax.random.uniform(k4, (HIDDEN[2], OUT_DIM), jnp.float32,
                               minval=-lin_bound, maxval=lin_bound)
    b_out = jax.random.uniform(k5, (OUT_DIM,), jnp.float32,
                               minval=-lin_bound, maxval=lin_bound)

    fwd = jax.jit(gcn_cluster_forward)
    z_l = fwd(x, adj, w1, w2, w3, w_out, b_out)
    z_l = jax.block_until_ready(z_l)

    assert z_l.shape == (N, OUT_DIM)

    # Tight check vs a mixed-precision (bf16 operand / f32 accum) reference,
    # loose check vs the pure-f32 PyTorch-equivalent reference.
    z_bf16 = reference_forward_bf16(x, adj, w1, w2, w3, w_out, b_out)
    z_f32 = reference_forward_f32(x, adj, w1, w2, w3, w_out, b_out)
    assert jnp.allclose(z_l, z_bf16, atol=1e-2, rtol=1e-2)
    assert jnp.allclose(z_l, z_f32, atol=5e-2, rtol=5e-2)

    print("KERNEL_OK")
</pallas_src>

<mosaic_0001>
module attributes {stable_mosaic.version = 11 : i64} {
  func.func @_matmul_kernel(%arg0: i32, %arg1: i32, %arg2: i32, %arg3: memref<128x128xbf16, #tpu.memory_space<vmem>>, %arg4: memref<128x256xbf16, #tpu.memory_space<vmem>>, %arg5: memref<128x256xbf16, #tpu.memory_space<vmem>>, %arg6: memref<128x256xf32, #tpu.memory_space<vmem>>) attributes {dimension_semantics = [#tpu.dimension_semantics<parallel>, #tpu.dimension_semantics<parallel>, #tpu.dimension_semantics<arbitrary>], iteration_bounds = array<i64: 1, 1, 1>, scalar_prefetch = 0 : i64, scratch_operands = 1 : i64, tpu.core_type = #tpu.core_type<tc>, window_params = [{transform_indices = @transform_0, window_bounds = array<i64: 128, 128>}, {transform_indices = @transform_1, window_bounds = array<i64: 128, 256>}, {transform_indices = @transform_2, window_bounds = array<i64: 128, 256>}]} {
    %c0_i32 = arith.constant 0 : i32
    %0 = arith.cmpi eq, %arg2, %c0_i32 : i32
    %1 = arith.extui %0 : i1 to i32
    %c0_i32_0 = arith.constant 0 : i32
    %2 = arith.cmpi ne, %1, %c0_i32_0 : i32
    scf.if %2 {
      %cst_10 = arith.constant 0.000000e+00 : f32
      %12 = vector.broadcast %cst_10 : f32 to vector<128x256xf32>
      %c0_11 = arith.constant 0 : index
      %c0_12 = arith.constant 0 : index
      %13 = vector.load %arg6[%c0_11, %c0_12] : memref<128x256xf32, #tpu.memory_space<vmem>>, vector<128x256xf32>
      tpu.vector_store %arg6[%c0_11, %c0_12], %12 {strides = array<i32>} : memref<128x256xf32, #tpu.memory_space<vmem>>, vector<128x256xf32>,
    } else {
    }
    %c0 = arith.constant 0 : index
    %c0_1 = arith.constant 0 : index
    %3 = vector.load %arg6[%c0, %c0_1] : memref<128x256xf32, #tpu.memory_space<vmem>>, vector<128x256xf32>
    %c0_2 = arith.constant 0 : index
    %c0_3 = arith.constant 0 : index
    %4 = vector.load %arg3[%c0_2, %c0_3] : memref<128x128xbf16, #tpu.memory_space<vmem>>, vector<128x128xbf16>
    %c0_4 = arith.constant 0 : index
    %c0_5 = arith.constant 0 : index
    %5 = vector.load %arg4[%c0_4, %c0_5] : memref<128x256xbf16, #tpu.memory_space<vmem>>, vector<128x256xbf16>
    %cst = arith.constant dense<0.000000e+00> : vector<128x256xf32>
    %6 = tpu.matmul %4, %5, %cst {dimension_numbers = #tpu.dot_dimension_numbers<[1], [0], [0], [1], [0, 0, 1, 1], [], []>} : vector<128x128xbf16>, vector<128x256xbf16>, vector<128x256xf32> -> vector<128x256xf32>
    %7 = arith.addf %3, %6 : vector<128x256xf32>
    %c0_6 = arith.constant 0 : index
    %c0_7 = arith.constant 0 : index
    %8 = vector.load %arg6[%c0_6, %c0_7] : memref<128x256xf32, #tpu.memory_space<vmem>>, vector<128x256xf32>
    tpu.vector_store %arg6[%c0_6, %c0_7], %7 {strides = array<i32>} : memref<128x256xf32, #tpu.memory_space<vmem>>, vector<128x256xf32>,
    %c0_i32_8 = arith.constant 0 : i32
    %9 = arith.cmpi eq, %arg2, %c0_i32_8 : i32
    %10 = arith.extui %9 : i1 to i32
    %c0_i32_9 = arith.constant 0 : i32
    %11 = arith.cmpi ne, %10, %c0_i32_9 : i32
    scf.if %11 {
      %c0_10 = arith.constant 0 : index
      %c0_11 = arith.constant 0 : index
      %12 = vector.load %arg6[%c0_10, %c0_11] : memref<128x256xf32, #tpu.memory_space<vmem>>, vector<128x256xf32>
      %13 = arith.truncf %12 : vector<128x256xf32> to vector<128x256xbf16>
      %c0_12 = arith.constant 0 : index
      %c0_13 = arith.constant 0 : index
      %14 = vector.load %arg5[%c0_12, %c0_13] : memref<128x256xbf16, #tpu.memory_space<vmem>>, vector<128x256xbf16>
      tpu.vector_store %arg5[%c0_12, %c0_13], %13 {strides = array<i32>} : memref<128x256xbf16, #tpu.memory_space<vmem>>, vector<128x256xbf16>,
    } else {
    }
    return
  }
  func.func @transform_0(%arg0: i32, %arg1: i32, %arg2: i32) -> (i32, i32) {
    %c0_i32 = arith.constant 0 : i32
    return %arg0, %arg2 : i32, i32
  }
  func.func @transform_1(%arg0: i32, %arg1: i32, %arg2: i32) -> (i32, i32) {
    %c0_i32 = arith.constant 0 : i32
    return %arg2, %arg1 : i32, i32
  }
  func.func @transform_2(%arg0: i32, %arg1: i32, %arg2: i32) -> (i32, i32) {
    %c0_i32 = arith.constant 0 : i32
    return %arg0, %arg1 : i32, i32
  }
}

module attributes {stable_mosaic.version = 11 : i64} {
  func.func @_matmul_kernel(%arg0: i32, %arg1: i32, %arg2: i32, %arg3: memref<128x128xbf16, #tpu.memory_space<vmem>>, %arg4: memref<128x256xbf16, #tpu.memory_space<vmem>>, %arg5: memref<128x256xbf16, #tpu.memory_space<vmem>>, %arg6: memref<128x256xf32, #tpu.memory_space<vmem>>) attributes {dimension_semantics = [#tpu.dimension_semantics<parallel>, #tpu.dimension_semantics<parallel>, #tpu.dimension_semantics<arbitrary>], iteration_bounds = array<i64: 1, 1, 1>, scalar_prefetch = 0 : i64, scratch_operands = 1 : i64, tpu.core_type = #tpu.core_type<tc>, window_params = [{transform_indices = @transform_0, window_bounds = array<i64: 128, 128>}, {transform_indices = @transform_1, window_bounds = array<i64: 128, 256>}, {transform_indices = @transform_2, window_bounds = array<i64: 128, 256>}]} {
    %c0_i32 = arith.constant 0 : i32
    %0 = arith.cmpi eq, %arg2, %c0_i32 : i32
    %1 = arith.extui %0 : i1 to i32
    %c0_i32_0 = arith.constant 0 : i32
    %2 = arith.cmpi ne, %1, %c0_i32_0 : i32
    scf.if %2 {
      %cst_10 = arith.constant 0.000000e+00 : f32
      %12 = vector.broadcast %cst_10 : f32 to vector<128x256xf32>
      %c0_11 = arith.constant 0 : index
      %c0_12 = arith.constant 0 : index
      %13 = vector.load %arg6[%c0_11, %c0_12] : memref<128x256xf32, #tpu.memory_space<vmem>>, vector<128x256xf32>
      tpu.vector_store %arg6[%c0_11, %c0_12], %12 {strides = array<i32>} : memref<128x256xf32, #tpu.memory_space<vmem>>, vector<128x256xf32>,
    } else {
    }
    %c0 = arith.constant 0 : index
    %c0_1 = arith.constant 0 : index
    %3 = vector.load %arg6[%c0, %c0_1] : memref<128x256xf32, #tpu.memory_space<vmem>>, vector<128x256xf32>
    %c0_2 = arith.constant 0 : index
    %c0_3 = arith.constant 0 : index
    %4 = vector.load %arg3[%c0_2, %c0_3] : memref<128x128xbf16, #tpu.memory_space<vmem>>, vector<128x128xbf16>
    %c0_4 = arith.constant 0 : index
    %c0_5 = arith.constant 0 : index
    %5 = vector.load %arg4[%c0_4, %c0_5] : memref<128x256xbf16, #tpu.memory_space<vmem>>, vector<128x256xbf16>
    %cst = arith.constant dense<0.000000e+00> : vector<128x256xf32>
    %6 = tpu.matmul %4, %5, %cst {dimension_numbers = #tpu.dot_dimension_numbers<[1], [0], [0], [1], [0, 0, 1, 1], [], []>} : vector<128x128xbf16>, vector<128x256xbf16>, vector<128x256xf32> -> vector<128x256xf32>
    %7 = arith.addf %3, %6 : vector<128x256xf32>
    %c0_6 = arith.constant 0 : index
    %c0_7 = arith.constant 0 : index
    %8 = vector.load %arg6[%c0_6, %c0_7] : memref<128x256xf32, #tpu.memory_space<vmem>>, vector<128x256xf32>
    tpu.vector_store %arg6[%c0_6, %c0_7], %7 {strides = array<i32>} : memref<128x256xf32, #tpu.memory_space<vmem>>, vector<128x256xf32>,
    %c0_i32_8 = arith.constant 0 : i32
    %9 = arith.cmpi eq, %arg2, %c0_i32_8 : i32
    %10 = arith.extui %9 : i1 to i32
    %c0_i32_9 = arith.constant 0 : i32
    %11 = arith.cmpi ne, %10, %c0_i32_9 : i32
    scf.if %11 {
      %c0_10 = arith.constant 0 : index
      %c0_11 = arith.constant 0 : index
      %12 = vector.load %arg6[%c0_10, %c0_11] : memref<128x256xf32, #tpu.memory_space<vmem>>, vector<128x256xf32>
      %cst_12 = arith.constant 0.000000e+00 : f32
      %13 = vector.broadcast %cst_12 : f32 to vector<128x256xf32>
      %14 = arith.maximumf %12, %13 : vector<128x256xf32>
      %15 = arith.truncf %14 : vector<128x256xf32> to vector<128x256xbf16>
      %c0_13 = arith.constant 0 : index
      %c0_14 = arith.constant 0 : index
      %16 = vector.load %arg5[%c0_13, %c0_14] : memref<128x256xbf16, #tpu.memory_space<vmem>>, vector<128x256xbf16>
      tpu.vector_store %arg5[%c0_13, %c0_14], %15 {strides = array<i32>} : memref<128x256xbf16, #tpu.memory_space<vmem>>, vector<128x256xbf16>,
    } else {
    }
    return
  }
  func.func @transform_0(%arg0: i32, %arg1: i32, %arg2: i32) -> (i32, i32) {
    %c0_i32 = arith.constant 0 : i32
    return %arg0, %arg2 : i32, i32
  }
  func.func @transform_1(%arg0: i32, %arg1: i32, %arg2: i32) -> (i32, i32) {
    %c0_i32 = arith.constant 0 : i32
    return %arg2, %arg1 : i32, i32
  }
  func.func @transform_2(%arg0: i32, %arg1: i32, %arg2: i32) -> (i32, i32) {
    %c0_i32 = arith.constant 0 : i32
    return %arg0, %arg1 : i32, i32
  }
}

module attributes {stable_mosaic.version = 11 : i64} {
  func.func @_matmul_kernel(%arg0: i32, %arg1: i32, %arg2: i32, %arg3: memref<128x256xbf16, #tpu.memory_space<vmem>>, %arg4: memref<256x128xbf16, #tpu.memory_space<vmem>>, %arg5: memref<128x128xbf16, #tpu.memory_space<vmem>>, %arg6: memref<128x128xf32, #tpu.memory_space<vmem>>) attributes {dimension_semantics = [#tpu.dimension_semantics<parallel>, #tpu.dimension_semantics<parallel>, #tpu.dimension_semantics<arbitrary>], iteration_bounds = array<i64: 1, 3, 1>, scalar_prefetch = 0 : i64, scratch_operands = 1 : i64, tpu.core_type = #tpu.core_type<tc>, window_params = [{transform_indices = @transform_0, window_bounds = array<i64: 128, 256>}, {transform_indices = @transform_1, window_bounds = array<i64: 256, 128>}, {transform_indices = @transform_2, window_bounds = array<i64: 128, 128>}]} {
    %c0_i32 = arith.constant 0 : i32
    %0 = arith.cmpi eq, %arg2, %c0_i32 : i32
    %1 = arith.extui %0 : i1 to i32
    %c0_i32_0 = arith.constant 0 : i32
    %2 = arith.cmpi ne, %1, %c0_i32_0 : i32
    scf.if %2 {
      %cst_10 = arith.constant 0.000000e+00 : f32
      %12 = vector.broadcast %cst_10 : f32 to vector<128x128xf32>
      %c0_11 = arith.constant 0 : index
      %c0_12 = arith.constant 0 : index
      %13 = vector.load %arg6[%c0_11, %c0_12] : memref<128x128xf32, #tpu.memory_space<vmem>>, vector<128x128xf32>
      tpu.vector_store %arg6[%c0_11, %c0_12], %12 {strides = array<i32>} : memref<128x128xf32, #tpu.memory_space<vmem>>, vector<128x128xf32>,
    } else {
    }
    %c0 = arith.constant 0 : index
    %c0_1 = arith.constant 0 : index
    %3 = vector.load %arg6[%c0, %c0_1] : memref<128x128xf32, #tpu.memory_space<vmem>>, vector<128x128xf32>
    %c0_2 = arith.constant 0 : index
    %c0_3 = arith.constant 0 : index
    %4 = vector.load %arg3[%c0_2, %c0_3] : memref<128x256xbf16, #tpu.memory_space<vmem>>, vector<128x256xbf16>
    %c0_4 = arith.constant 0 : index
    %c0_5 = arith.constant 0 : index
    %5 = vector.load %arg4[%c0_4, %c0_5] : memref<256x128xbf16, #tpu.memory_space<vmem>>, vector<256x128xbf16>
    %cst = arith.constant dense<0.000000e+00> : vector<128x128xf32>
    %6 = tpu.matmul %4, %5, %cst {dimension_numbers = #tpu.dot_dimension_numbers<[1], [0], [0], [1], [0, 0, 1, 1], [], []>} : vector<128x256xbf16>, vector<256x128xbf16>, vector<128x128xf32> -> vector<128x128xf32>
    %7 = arith.addf %3, %6 : vector<128x128xf32>
    %c0_6 = arith.constant 0 : index
    %c0_7 = arith.constant 0 : index
    %8 = vector.load %arg6[%c0_6, %c0_7] : memref<128x128xf32, #tpu.memory_space<vmem>>, vector<128x128xf32>
    tpu.vector_store %arg6[%c0_6, %c0_7], %7 {strides = array<i32>} : memref<128x128xf32, #tpu.memory_space<vmem>>, vector<128x128xf32>,
    %c0_i32_8 = arith.constant 0 : i32
    %9 = arith.cmpi eq, %arg2, %c0_i32_8 : i32
    %10 = arith.extui %9 : i1 to i32
    %c0_i32_9 = arith.constant 0 : i32
    %11 = arith.cmpi ne, %10, %c0_i32_9 : i32
    scf.if %11 {
      %c0_10 = arith.constant 0 : index
      %c0_11 = arith.constant 0 : index
      %12 = vector.load %arg6[%c0_10, %c0_11] : memref<128x128xf32, #tpu.memory_space<vmem>>, vector<128x128xf32>
      %13 = arith.truncf %12 : vector<128x128xf32> to vector<128x128xbf16>
      %c0_12 = arith.constant 0 : index
      %c0_13 = arith.constant 0 : index
      %14 = vector.load %arg5[%c0_12, %c0_13] : memref<128x128xbf16, #tpu.memory_space<vmem>>, vector<128x128xbf16>
      tpu.vector_store %arg5[%c0_12, %c0_13], %13 {strides = array<i32>} : memref<128x128xbf16, #tpu.memory_space<vmem>>, vector<128x128xbf16>,
    } else {
    }
    return
  }
  func.func @transform_0(%arg0: i32, %arg1: i32, %arg2: i32) -> (i32, i32) {
    %c0_i32 = arith.constant 0 : i32
    return %arg0, %arg2 : i32, i32
  }
  func.func @transform_1(%arg0: i32, %arg1: i32, %arg2: i32) -> (i32, i32) {
    %c0_i32 = arith.constant 0 : i32
    return %arg2, %arg1 : i32, i32
  }
  func.func @transform_2(%arg0: i32, %arg1: i32, %arg2: i32) -> (i32, i32) {
    %c0_i32 = arith.constant 0 : i32
    return %arg0, %arg1 : i32, i32
  }
}

module attributes {stable_mosaic.version = 11 : i64} {
  func.func @_matmul_kernel(%arg0: i32, %arg1: i32, %arg2: i32, %arg3: memref<128x128xbf16, #tpu.memory_space<vmem>>, %arg4: memref<128x128xbf16, #tpu.memory_space<vmem>>, %arg5: memref<128x128xbf16, #tpu.memory_space<vmem>>, %arg6: memref<128x128xf32, #tpu.memory_space<vmem>>) attributes {dimension_semantics = [#tpu.dimension_semantics<parallel>, #tpu.dimension_semantics<parallel>, #tpu.dimension_semantics<arbitrary>], iteration_bounds = array<i64: 1, 3, 1>, scalar_prefetch = 0 : i64, scratch_operands = 1 : i64, tpu.core_type = #tpu.core_type<tc>, window_params = [{transform_indices = @transform_0, window_bounds = array<i64: 128, 128>}, {transform_indices = @transform_1, window_bounds = array<i64: 128, 128>}, {transform_indices = @transform_2, window_bounds = array<i64: 128, 128>}]} {
    %c0_i32 = arith.constant 0 : i32
    %0 = arith.cmpi eq, %arg2, %c0_i32 : i32
    %1 = arith.extui %0 : i1 to i32
    %c0_i32_0 = arith.constant 0 : i32
    %2 = arith.cmpi ne, %1, %c0_i32_0 : i32
    scf.if %2 {
      %cst_10 = arith.constant 0.000000e+00 : f32
      %12 = vector.broadcast %cst_10 : f32 to vector<128x128xf32>
      %c0_11 = arith.constant 0 : index
      %c0_12 = arith.constant 0 : index
      %13 = vector.load %arg6[%c0_11, %c0_12] : memref<128x128xf32, #tpu.memory_space<vmem>>, vector<128x128xf32>
      tpu.vector_store %arg6[%c0_11, %c0_12], %12 {strides = array<i32>} : memref<128x128xf32, #tpu.memory_space<vmem>>, vector<128x128xf32>,
    } else {
    }
    %c0 = arith.constant 0 : index
    %c0_1 = arith.constant 0 : index
    %3 = vector.load %arg6[%c0, %c0_1] : memref<128x128xf32, #tpu.memory_space<vmem>>, vector<128x128xf32>
    %c0_2 = arith.constant 0 : index
    %c0_3 = arith.constant 0 : index
    %4 = vector.load %arg3[%c0_2, %c0_3] : memref<128x128xbf16, #tpu.memory_space<vmem>>, vector<128x128xbf16>
    %c0_4 = arith.constant 0 : index
    %c0_5 = arith.constant 0 : index
    %5 = vector.load %arg4[%c0_4, %c0_5] : memref<128x128xbf16, #tpu.memory_space<vmem>>, vector<128x128xbf16>
    %cst = arith.constant dense<0.000000e+00> : vector<128x128xf32>
    %6 = tpu.matmul %4, %5, %cst {dimension_numbers = #tpu.dot_dimension_numbers<[1], [0], [0], [1], [0, 0, 1, 1], [], []>} : vector<128x128xbf16>, vector<128x128xbf16>, vector<128x128xf32> -> vector<128x128xf32>
    %7 = arith.addf %3, %6 : vector<128x128xf32>
    %c0_6 = arith.constant 0 : index
    %c0_7 = arith.constant 0 : index
    %8 = vector.load %arg6[%c0_6, %c0_7] : memref<128x128xf32, #tpu.memory_space<vmem>>, vector<128x128xf32>
    tpu.vector_store %arg6[%c0_6, %c0_7], %7 {strides = array<i32>} : memref<128x128xf32, #tpu.memory_space<vmem>>, vector<128x128xf32>,
    %c0_i32_8 = arith.constant 0 : i32
    %9 = arith.cmpi eq, %arg2, %c0_i32_8 : i32
    %10 = arith.extui %9 : i1 to i32
    %c0_i32_9 = arith.constant 0 : i32
    %11 = arith.cmpi ne, %10, %c0_i32_9 : i32
    scf.if %11 {
      %c0_10 = arith.constant 0 : index
      %c0_11 = arith.constant 0 : index
      %12 = vector.load %arg6[%c0_10, %c0_11] : memref<128x128xf32, #tpu.memory_space<vmem>>, vector<128x128xf32>
      %cst_12 = arith.constant 0.000000e+00 : f32
      %13 = vector.broadcast %cst_12 : f32 to vector<128x128xf32>
      %14 = arith.maximumf %12, %13 : vector<128x128xf32>
      %15 = arith.truncf %14 : vector<128x128xf32> to vector<128x128xbf16>
      %c0_13 = arith.constant 0 : index
      %c0_14 = arith.constant 0 : index
      %16 = vector.load %arg5[%c0_13, %c0_14] : memref<128x128xbf16, #tpu.memory_space<vmem>>, vector<128x128xbf16>
      tpu.vector_store %arg5[%c0_13, %c0_14], %15 {strides = array<i32>} : memref<128x128xbf16, #tpu.memory_space<vmem>>, vector<128x128xbf16>,
    } else {
    }
    return
  }
  func.func @transform_0(%arg0: i32, %arg1: i32, %arg2: i32) -> (i32, i32) {
    %c0_i32 = arith.constant 0 : i32
    return %arg0, %arg2 : i32, i32
  }
  func.func @transform_1(%arg0: i32, %arg1: i32, %arg2: i32) -> (i32, i32) {
    %c0_i32 = arith.constant 0 : i32
    return %arg2, %arg1 : i32, i32
  }
  func.func @transform_2(%arg0: i32, %arg1: i32, %arg2: i32) -> (i32, i32) {
    %c0_i32 = arith.constant 0 : i32
    return %arg0, %arg1 : i32, i32
  }
}

module attributes {stable_mosaic.version = 11 : i64} {
  func.func @_matmul_kernel(%arg0: i32, %arg1: i32, %arg2: i32, %arg3: memref<128x128xbf16, #tpu.memory_space<vmem>>, %arg4: memref<128x256xbf16, #tpu.memory_space<vmem>>, %arg5: memref<128x256xbf16, #tpu.memory_space<vmem>>, %arg6: memref<128x256xf32, #tpu.memory_space<vmem>>) attributes {dimension_semantics = [#tpu.dimension_semantics<parallel>, #tpu.dimension_semantics<parallel>, #tpu.dimension_semantics<arbitrary>], iteration_bounds = array<i64: 1, 1, 3>, scalar_prefetch = 0 : i64, scratch_operands = 1 : i64, tpu.core_type = #tpu.core_type<tc>, window_params = [{transform_indices = @transform_0, window_bounds = array<i64: 128, 128>}, {transform_indices = @transform_1, window_bounds = array<i64: 128, 256>}, {transform_indices = @transform_2, window_bounds = array<i64: 128, 256>}]} {
    %c0_i32 = arith.constant 0 : i32
    %0 = arith.cmpi eq, %arg2, %c0_i32 : i32
    %1 = arith.extui %0 : i1 to i32
    %c0_i32_0 = arith.constant 0 : i32
    %2 = arith.cmpi ne, %1, %c0_i32_0 : i32
    scf.if %2 {
      %cst_9 = arith.constant 0.000000e+00 : f32
      %12 = vector.broadcast %cst_9 : f32 to vector<128x256xf32>
      %c0_10 = arith.constant 0 : index
      %c0_11 = arith.constant 0 : index
      %13 = vector.load %arg6[%c0_10, %c0_11] : memref<128x256xf32, #tpu.memory_space<vmem>>, vector<128x256xf32>
      tpu.vector_store %arg6[%c0_10, %c0_11], %12 {strides = array<i32>} : memref<128x256xf32, #tpu.memory_space<vmem>>, vector<128x256xf32>,
    } else {
    }
    %c0 = arith.constant 0 : index
    %c0_1 = arith.constant 0 : index
    %3 = vector.load %arg6[%c0, %c0_1] : memref<128x256xf32, #tpu.memory_space<vmem>>, vector<128x256xf32>
    %c0_2 = arith.constant 0 : index
    %c0_3 = arith.constant 0 : index
    %4 = vector.load %arg3[%c0_2, %c0_3] : memref<128x128xbf16, #tpu.memory_space<vmem>>, vector<128x128xbf16>
    %c0_4 = arith.constant 0 : index
    %c0_5 = arith.constant 0 : index
    %5 = vector.load %arg4[%c0_4, %c0_5] : memref<128x256xbf16, #tpu.memory_space<vmem>>, vector<128x256xbf16>
    %cst = arith.constant dense<0.000000e+00> : vector<128x256xf32>
    %6 = tpu.matmul %4, %5, %cst {dimension_numbers = #tpu.dot_dimension_numbers<[1], [0], [0], [1], [0, 0, 1, 1], [], []>} : vector<128x128xbf16>, vector<128x256xbf16>, vector<128x256xf32> -> vector<128x256xf32>
    %7 = arith.addf %3, %6 : vector<128x256xf32>
    %c0_6 = arith.constant 0 : index
    %c0_7 = arith.constant 0 : index
    %8 = vector.load %arg6[%c0_6, %c0_7] : memref<128x256xf32, #tpu.memory_space<vmem>>, vector<128x256xf32>
    tpu.vector_store %arg6[%c0_6, %c0_7], %7 {strides = array<i32>} : memref<128x256xf32, #tpu.memory_space<vmem>>, vector<128x256xf32>,
    %c2_i32 = arith.constant 2 : i32
    %9 = arith.cmpi eq, %arg2, %c2_i32 : i32
    %10 = arith.extui %9 : i1 to i32
    %c0_i32_8 = arith.constant 0 : i32
    %11 = arith.cmpi ne, %10, %c0_i32_8 : i32
    scf.if %11 {
      %c0_9 = arith.constant 0 : index
      %c0_10 = arith.constant 0 : index
      %12 = vector.load %arg6[%c0_9, %c0_10] : memref<128x256xf32, #tpu.memory_space<vmem>>, vector<128x256xf32>
      %13 = arith.truncf %12 : vector<128x256xf32> to vector<128x256xbf16>
      %c0_11 = arith.constant 0 : index
      %c0_12 = arith.constant 0 : index
      %14 = vector.load %arg5[%c0_11, %c0_12] : memref<128x256xbf16, #tpu.memory_space<vmem>>, vector<128x256xbf16>
      tpu.vector_store %arg5[%c0_11, %c0_12], %13 {strides = array<i32>} : memref<128x256xbf16, #tpu.memory_space<vmem>>, vector<128x256xbf16>,
    } else {
    }
    return
  }
  func.func @transform_0(%arg0: i32, %arg1: i32, %arg2: i32) -> (i32, i32) {
    %c0_i32 = arith.constant 0 : i32
    return %arg0, %arg2 : i32, i32
  }
  func.func @transform_1(%arg0: i32, %arg1: i32, %arg2: i32) -> (i32, i32) {
    %c0_i32 = arith.constant 0 : i32
    return %arg2, %arg1 : i32, i32
  }
  func.func @transform_2(%arg0: i32, %arg1: i32, %arg2: i32) -> (i32, i32) {
    %c0_i32 = arith.constant 0 : i32
    return %arg0, %arg1 : i32, i32
  }
}

module attributes {stable_mosaic.version = 11 : i64} {
  func.func @_matmul_bias_kernel(%arg0: i32, %arg1: i32, %arg2: i32, %arg3: memref<128x256xbf16, #tpu.memory_space<vmem>>, %arg4: memref<256x128xbf16, #tpu.memory_space<vmem>>, %arg5: memref<1x128xf32, #tpu.memory_space<vmem>>, %arg6: memref<128x128xf32, #tpu.memory_space<vmem>>, %arg7: memref<128x128xf32, #tpu.memory_space<vmem>>) attributes {dimension_semantics = [#tpu.dimension_semantics<parallel>, #tpu.dimension_semantics<parallel>, #tpu.dimension_semantics<arbitrary>], iteration_bounds = array<i64: 1, 1, 1>, scalar_prefetch = 0 : i64, scratch_operands = 1 : i64, tpu.core_type = #tpu.core_type<tc>, window_params = [{transform_indices = @transform_0, window_bounds = array<i64: 128, 256>}, {transform_indices = @transform_1, window_bounds = array<i64: 256, 128>}, {transform_indices = @transform_2, window_bounds = array<i64: 1, 128>}, {transform_indices = @transform_3, window_bounds = array<i64: 128, 128>}]} {
    %c0_i32 = arith.constant 0 : i32
    %0 = arith.cmpi eq, %arg2, %c0_i32 : i32
    %1 = arith.extui %0 : i1 to i32
    %c0_i32_0 = arith.constant 0 : i32
    %2 = arith.cmpi ne, %1, %c0_i32_0 : i32
    scf.if %2 {
      %cst_10 = arith.constant 0.000000e+00 : f32
      %12 = vector.broadcast %cst_10 : f32 to vector<128x128xf32>
      %c0_11 = arith.constant 0 : index
      %c0_12 = arith.constant 0 : index
      %13 = vector.load %arg7[%c0_11, %c0_12] : memref<128x128xf32, #tpu.memory_space<vmem>>, vector<128x128xf32>
      tpu.vector_store %arg7[%c0_11, %c0_12], %12 {strides = array<i32>} : memref<128x128xf32, #tpu.memory_space<vmem>>, vector<128x128xf32>,
    } else {
    }
    %c0 = arith.constant 0 : index
    %c0_1 = arith.constant 0 : index
    %3 = vector.load %arg7[%c0, %c0_1] : memref<128x128xf32, #tpu.memory_space<vmem>>, vector<128x128xf32>
    %c0_2 = arith.constant 0 : index
    %c0_3 = arith.constant 0 : index
    %4 = vector.load %arg3[%c0_2, %c0_3] : memref<128x256xbf16, #tpu.memory_space<vmem>>, vector<128x256xbf16>
    %c0_4 = arith.constant 0 : index
    %c0_5 = arith.constant 0 : index
    %5 = vector.load %arg4[%c0_4, %c0_5] : memref<256x128xbf16, #tpu.memory_space<vmem>>, vector<256x128xbf16>
    %cst = arith.constant dense<0.000000e+00> : vector<128x128xf32>
    %6 = tpu.matmul %4, %5, %cst {dimension_numbers = #tpu.dot_dimension_numbers<[1], [0], [0], [1], [0, 0, 1, 1], [], []>} : vector<128x256xbf16>, vector<256x128xbf16>, vector<128x128xf32> -> vector<128x128xf32>
    %7 = arith.addf %3, %6 : vector<128x128xf32>
    %c0_6 = arith.constant 0 : index
    %c0_7 = arith.constant 0 : index
    %8 = vector.load %arg7[%c0_6, %c0_7] : memref<128x128xf32, #tpu.memory_space<vmem>>, vector<128x128xf32>
    tpu.vector_store %arg7[%c0_6, %c0_7], %7 {strides = array<i32>} : memref<128x128xf32, #tpu.memory_space<vmem>>, vector<128x128xf32>,
    %c0_i32_8 = arith.constant 0 : i32
    %9 = arith.cmpi eq, %arg2, %c0_i32_8 : i32
    %10 = arith.extui %9 : i1 to i32
    %c0_i32_9 = arith.constant 0 : i32
    %11 = arith.cmpi ne, %10, %c0_i32_9 : i32
    scf.if %11 {
      %c0_10 = arith.constant 0 : index
      %c0_11 = arith.constant 0 : index
      %12 = vector.load %arg7[%c0_10, %c0_11] : memref<128x128xf32, #tpu.memory_space<vmem>>, vector<128x128xf32>
      %c0_12 = arith.constant 0 : index
      %c0_13 = arith.constant 0 : index
      %13 = vector.load %arg5[%c0_12, %c0_13] : memref<1x128xf32, #tpu.memory_space<vmem>>, vector<1x128xf32>
      %14 = vector.broadcast %13 : vector<1x128xf32> to vector<128x128xf32>
      %15 = arith.addf %12, %14 : vector<128x128xf32>
      %cst_14 = arith.constant 0.000000e+00 : f32
      %16 = vector.broadcast %cst_14 : f32 to vector<128x128xf32>
      %17 = arith.maximumf %15, %16 : vector<128x128xf32>
      %c0_15 = arith.constant 0 : index
      %c0_16 = arith.constant 0 : index
      %18 = vector.load %arg6[%c0_15, %c0_16] : memref<128x128xf32, #tpu.memory_space<vmem>>, vector<128x128xf32>
      tpu.vector_store %arg6[%c0_15, %c0_16], %17 {strides = array<i32>} : memref<128x128xf32, #tpu.memory_space<vmem>>, vector<128x128xf32>,
    } else {
    }
    return
  }
  func.func @transform_0(%arg0: i32, %arg1: i32, %arg2: i32) -> (i32, i32) {
    %c0_i32 = arith.constant 0 : i32
    return %arg0, %arg2 : i32, i32
  }
  func.func @transform_1(%arg0: i32, %arg1: i32, %arg2: i32) -> (i32, i32) {
    %c0_i32 = arith.constant 0 : i32
    return %arg2, %arg1 : i32, i32
  }
  func.func @transform_2(%arg0: i32, %arg1: i32, %arg2: i32) -> (i32, i32) {
    %c0_i32 = arith.constant 0 : i32
    %c0_i32_0 = arith.constant 0 : i32
    return %c0_i32, %arg1 : i32, i32
  }
  func.func @transform_3(%arg0: i32, %arg1: i32, %arg2: i32) -> (i32, i32) {
    %c0_i32 = arith.constant 0 : i32
    return %arg0, %arg1 : i32, i32
  }
}

</mosaic_0001>

<bundles_post_ra>
// kernel: gcn_cluster_forward.7
= control target key start
LH: loop header
LB: loop body
LE: loop exit
PB: predicated region body
PF: predicated region fallthrough
CT: control target
= control target key end

     0   :  { %s791_s1 = inlined_call_operand.vmem [shape: bf16[128,256], index: 1, kind: input, shape index: {}]   ;;  %s792_s0 = inlined_call_operand.vmem [shape: bf16[128,128], index: 0, kind: input, shape index: {}]   ;;  %s793_s2 = inlined_call_operand.vmem [shape: bf16[128,256], index: 2, kind: output, shape index: {}]  }
   0x1   :  { %v562_v0 = vld [vmem:[%s791_s1 + $0x70] sm:$0xf]  ;;  %v591_v1 = vld [vmem:[%s791_s1 + $0x74] sm:$0xf0]  ;;  %v590_v2 = vld [vmem:[%s791_s1 + $0x74] sm:$0xf] }
   0x2   :  { %v563_v3 = vor.u32 %v591_v1, %v562_v0  ;;  %v564_v4 = vld [vmem:[%s791_s1 + $0x78] sm:$0xf0]  ;;  %v554_v5 = vld [vmem:[%s791_s1 + $0x60] sm:$0xf]  ;;  %v589_v6 = vld [vmem:[%s791_s1 + $0x64] sm:$0xf0] }
   0x3   :  { %v567_v7 = vor.u32 %v590_v2, %v564_v4  ;;  %v588_v8 = vld [vmem:[%s791_s1 + $0x64] sm:$0xf]  ;;  %v556_v9 = vld [vmem:[%s791_s1 + $0x68] sm:$0xf0]  ;;  %v555_v10 = vor.u32 %v589_v6, %v554_v5  ;;  %v546_v12 = vld [vmem:[%s791_s1 + $0x50] sm:$0xf] }
   0x4   :  { %239 = vmatpush.bf16.msra.mxu0 %v563_v3  ;;  %592 = vmatpush.bf16.msra.mxu2 %v563_v3  ;;  %v559_v11 = vor.u32 %v588_v8, %v556_v9  ;;  %v587_v13 = vld [vmem:[%s791_s1 + $0x54] sm:$0xf0]  ;;  %v586_v14 = vld [vmem:[%s791_s1 + $0x54] sm:$0xf]  ;;  %v548_v15 = vld [vmem:[%s791_s1 + $0x58] sm:$0xf0] }
   0x5   :  { %288 = vmatpush.bf16.msra.mxu1 %v567_v7  ;;  %600 = vmatpush.bf16.msra.mxu3 %v567_v7  ;;  %v547_v16 = vor.u32 %v587_v13, %v546_v12  ;;  %v551_v17 = vor.u32 %v586_v14, %v548_v15  ;;  %v538_v18 = vld [vmem:[%s791_s1 + $0x40] sm:$0xf]  ;;  %v585_v19 = vld [vmem:[%s791_s1 + $0x44] sm:$0xf0]  ;;  %v584_v20 = vld [vmem:[%s791_s1 + $0x44] sm:$0xf] }
   0x6   :  { %v540_v21 = vld [vmem:[%s791_s1 + $0x48] sm:$0xf0]  ;;  %v539_v22 = vor.u32 %v585_v19, %v538_v18  ;;  %v530_v24 = vld [vmem:[%s791_s1 + $0x30] sm:$0xf]  ;;  %v583_v25 = vld [vmem:[%s791_s1 + $0x34] sm:$0xf0] }
   0x7   :  { %v543_v23 = vor.u32 %v584_v20, %v540_v21  ;;  %v582_v26 = vld [vmem:[%s791_s1 + $0x34] sm:$0xf]  ;;  %v532_v27 = vld [vmem:[%s791_s1 + $0x38] sm:$0xf0]  ;;  %v531_v28 = vor.u32 %v583_v25, %v530_v24  ;;  %v522_v30 = vld [vmem:[%s791_s1 + $0x20] sm:$0xf] }
   0x8   :  { %240 = vmatpush.bf16.msra.mxu0 %v555_v10  ;;  %593 = vmatpush.bf16.msra.mxu2 %v555_v10  ;;  %v535_v29 = vor.u32 %v582_v26, %v532_v27  ;;  %v581_v31 = vld [vmem:[%s791_s1 + $0x24] sm:$0xf0]  ;;  %v580_v32 = vld [vmem:[%s791_s1 + $0x24] sm:$0xf]  ;;  %v524_v33 = vld [vmem:[%s791_s1 + $0x28] sm:$0xf0] }
   0x9   :  { %289 = vmatpush.bf16.msra.mxu1 %v559_v11  ;;  %601 = vmatpush.bf16.msra.mxu3 %v559_v11  ;;  %v523_v34 = vor.u32 %v581_v31, %v522_v30  ;;  %v527_v35 = vor.u32 %v580_v32, %v524_v33  ;;  %v514_v36 = vld [vmem:[%s791_s1 + $0x10] sm:$0xf]  ;;  %v579_v37 = vld [vmem:[%s791_s1 + $0x14] sm:$0xf0]  ;;  %v578_v38 = vld [vmem:[%s791_s1 + $0x14] sm:$0xf] }
   0xa   :  { %v516_v39 = vld [vmem:[%s791_s1 + $0x18] sm:$0xf0]  ;;  %v515_v40 = vor.u32 %v579_v37, %v514_v36  ;;  %v506_v42 = vld [vmem:[%s791_s1] sm:$0xf]  ;;  %v577_v43 = vld [vmem:[%s791_s1 + $0x4] sm:$0xf0] }
   0xb   :  { %v519_v41 = vor.u32 %v578_v38, %v516_v39  ;;  %v576_v44 = vld [vmem:[%s791_s1 + $0x4] sm:$0xf]  ;;  %v508_v45 = vld [vmem:[%s791_s1 + $0x8] sm:$0xf0]  ;;  %v507_v46 = vor.u32 %v577_v43, %v506_v42  ;;  %v570_v52 = vld [vmem:[%s792_s0 + $0x10] sm:$0xff] }
   0xc   :  { %241 = vmatpush.bf16.msra.mxu0 %v547_v16  ;;  %594 = vmatpush.bf16.msra.mxu2 %v547_v16  ;;  %v511_v47 = vor.u32 %v576_v44, %v508_v45  ;;  %v568_v48 = vld [vmem:[%s792_s0] sm:$0xff]  ;;  %v569_v50 = vld [vmem:[%s792_s0 + $0x8] sm:$0xff]  ;;  %v574_v53 = vld [vmem:[%s792_s0 + $0x30] sm:$0xff] }
   0xd   :  { %290 = vmatpush.bf16.msra.mxu1 %v551_v17  ;;  %602 = vmatpush.bf16.msra.mxu3 %v551_v17  ;;  %v572_v49 = vld [vmem:[%s792_s0 + $0x20] sm:$0xff]  ;;  %v573_v51 = vld [vmem:[%s792_s0 + $0x28] sm:$0xff]  ;;  %v571_v54 = vld [vmem:[%s792_s0 + $0x18] sm:$0xff] }
   0xe   :  { %v575_v55 = vld [vmem:[%s792_s0 + $0x38] sm:$0xff] }
  0x10   :  { %242 = vmatpush.bf16.msra.mxu0 %v539_v22  ;;  %595 = vmatpush.bf16.msra.mxu2 %v539_v22 }
  0x11   :  { %291 = vmatpush.bf16.msra.mxu1 %v543_v23  ;;  %603 = vmatpush.bf16.msra.mxu3 %v543_v23 }
  0x14   :  { %243 = vmatpush.bf16.msra.mxu0 %v531_v28  ;;  %596 = vmatpush.bf16.msra.mxu2 %v531_v28 }
  0x15   :  { %292 = vmatpush.bf16.msra.mxu1 %v535_v29  ;;  %604 = vmatpush.bf16.msra.mxu3 %v535_v29 }
  0x18   :  { %244 = vmatpush.bf16.msra.mxu0 %v523_v34  ;;  %597 = vmatpush.bf16.msra.mxu2 %v523_v34 }
  0x19   :  { %293 = vmatpush.bf16.msra.mxu1 %v527_v35  ;;  %605 = vmatpush.bf16.msra.mxu3 %v527_v35 }
  0x1c   :  { %245 = vmatpush.bf16.msra.mxu0 %v515_v40  ;;  %598 = vmatpush.bf16.msra.mxu2 %v515_v40 }
  0x1d   :  { %294 = vmatpush.bf16.msra.mxu1 %v519_v41  ;;  %606 = vmatpush.bf16.msra.mxu3 %v519_v41 }
  0x20   :  { %246 = vmatpush.bf16.msra.mxu0 %v507_v46  ;;  %599 = vmatpush.bf16.msra.mxu2 %v507_v46 }
  0x21   :  { %295 = vmatpush.bf16.msra.mxu1 %v511_v47  ;;  %607 = vmatpush.bf16.msra.mxu3 %v511_v47 }
  0x23   :  { %247 = vmatmul.bf16.vlgmr.msra.gmra.mxu0 %v568_v48  ;;  %267 = vmatmul.bf16.vlgmr.msra.gmra.mxu2 %v572_v49 }
  0x24   :  { %296 = vmatmul.bf16.vlgmr.msra.gmra.mxu1 %v568_v48  ;;  %316 = vmatmul.bf16.vlgmr.msra.gmra.mxu3 %v572_v49 }
  0x33   :  { %252 = vmatmul.bf16.gmra.mxu0 %v569_v50  ;;  %272 = vmatmul.bf16.gmra.mxu2 %v573_v51 }
  0x34   :  { %301 = vmatmul.bf16.gmra.mxu1 %v569_v50  ;;  %321 = vmatmul.bf16.gmra.mxu3 %v573_v51 }
  0x43   :  { %257 = vmatmul.bf16.gmra.mxu0 %v570_v52  ;;  %277 = vmatmul.bf16.gmra.mxu2 %v574_v53 }
  0x44   :  { %306 = vmatmul.bf16.gmra.mxu1 %v570_v52  ;;  %326 = vmatmul.bf16.gmra.mxu3 %v574_v53 }
  0x53   :  { %262 = vmatmul.bf16.gmra.mxu0 %v571_v54  ;;  %282 = vmatmul.bf16.gmra.mxu2 %v575_v55 }
  0x54   :  { %311 = vmatmul.bf16.gmra.mxu1 %v571_v54  ;;  %331 = vmatmul.bf16.gmra.mxu3 %v575_v55 }
  0xa0   :  { %v248_v56 = vpop.f32.mrf.mxu0 }
  0xa1   :  { %v297_v57 = vpop.f32.mrf.mxu1 }
  0xa2   :  { %v436_v58 = vpack.c.bf16 %v297_v57, %v248_v56 }
  0xa4   :  { %452 = vst [vmem:[%s793_s2] sm:$0xff] %v436_v58 }
  0xa6   :  { %v268_v59 = vpop.f32.mrf.mxu2 }
  0xa7   :  { %v317_v60 = vpop.f32.mrf.mxu3 }
  0xa8   :  { %v444_v61 = vpack.c.bf16 %v317_v60, %v268_v59  ;;  %v250_v62 = vpop.f32.mrf.mxu0 }
  0xa9   :  { %v299_v63 = vpop.f32.mrf.mxu1 }
  0xaa   :  { %460 = vst [vmem:[%s793_s2 + $0x40] sm:$0xff] %v444_v61  ;;  %v437_v0 = vpack.c.bf16 %v299_v63, %v250_v62 }
  0xac   :  { %453 = vst [vmem:[%s793_s2 + $0x8] sm:$0xff] %v437_v0 }
  0xae   :  { %v270_v1 = vpop.f32.mrf.mxu2 }
  0xaf   :  { %v319_v2 = vpop.f32.mrf.mxu3 }
  0xb0   :  { %v445_v3 = vpack.c.bf16 %v319_v2, %v270_v1  ;;  %v253_v4 = vpop.f32.mrf.mxu0 }
  0xb1   :  { %v302_v5 = vpop.f32.mrf.mxu1 }
  0xb2   :  { %461 = vst [vmem:[%s793_s2 + $0x48] sm:$0xff] %v445_v3  ;;  %v438_v6 = vpack.c.bf16 %v302_v5, %v253_v4 }
  0xb4   :  { %454 = vst [vmem:[%s793_s2 + $0x10] sm:$0xff] %v438_v6 }
  0xb6   :  { %v273_v7 = vpop.f32.mrf.mxu2 }
  0xb7   :  { %v322_v8 = vpop.f32.mrf.mxu3 }
  0xb8   :  { %v446_v9 = vpack.c.bf16 %v322_v8, %v273_v7  ;;  %v255_v10 = vpop.f32.mrf.mxu0 }
  0xb9   :  { %v304_v11 = vpop.f32.mrf.mxu1 }
  0xba   :  { %462 = vst [vmem:[%s793_s2 + $0x50] sm:$0xff] %v446_v9  ;;  %v439_v12 = vpack.c.bf16 %v304_v11, %v255_v10 }
  0xbc   :  { %455 = vst [vmem:[%s793_s2 + $0x18] sm:$0xff] %v439_v12 }
  0xbe   :  { %v275_v13 = vpop.f32.mrf.mxu2 }
  0xbf   :  { %v324_v14 = vpop.f32.mrf.mxu3 }
  0xc0   :  { %v447_v15 = vpack.c.bf16 %v324_v14, %v275_v13  ;;  %v258_v16 = vpop.f32.mrf.mxu0 }
  0xc1   :  { %v307_v17 = vpop.f32.mrf.mxu1 }
  0xc2   :  { %463 = vst [vmem:[%s793_s2 + $0x58] sm:$0xff] %v447_v15  ;;  %v440_v18 = vpack.c.bf16 %v307_v17, %v258_v16 }
  0xc4   :  { %456 = vst [vmem:[%s793_s2 + $0x20] sm:$0xff] %v440_v18 }
  0xc6   :  { %v278_v19 = vpop.f32.mrf.mxu2 }
  0xc7   :  { %v327_v20 = vpop.f32.mrf.mxu3 }
  0xc8   :  { %v448_v21 = vpack.c.bf16 %v327_v20, %v278_v19  ;;  %v260_v22 = vpop.f32.mrf.mxu0 }
  0xc9   :  { %v309_v23 = vpop.f32.mrf.mxu1 }
  0xca   :  { %464 = vst [vmem:[%s793_s2 + $0x60] sm:$0xff] %v448_v21  ;;  %v441_v24 = vpack.c.bf16 %v309_v23, %v260_v22 }
  0xcc   :  { %457 = vst [vmem:[%s793_s2 + $0x28] sm:$0xff] %v441_v24 }
  0xce   :  { %v280_v25 = vpop.f32.mrf.mxu2 }
  0xcf   :  { %v329_v26 = vpop.f32.mrf.mxu3 }
  0xd0   :  { %v449_v27 = vpack.c.bf16 %v329_v26, %v280_v25  ;;  %v263_v28 = vpop.f32.mrf.mxu0 }
  0xd1   :  { %v312_v29 = vpop.f32.mrf.mxu1 }
  0xd2   :  { %465 = vst [vmem:[%s793_s2 + $0x68] sm:$0xff] %v449_v27  ;;  %v442_v30 = vpack.c.bf16 %v312_v29, %v263_v28 }
  0xd4   :  { %458 = vst [vmem:[%s793_s2 + $0x30] sm:$0xff] %v442_v30 }
  0xd6   :  { %v283_v31 = vpop.f32.mrf.mxu2 }
  0xd7   :  { %v332_v32 = vpop.f32.mrf.mxu3 }
  0xd8   :  { %v450_v33 = vpack.c.bf16 %v332_v32, %v283_v31  ;;  %v265_v34 = vpop.f32.mrf.mxu0 }
  0xd9   :  { %v314_v35 = vpop.f32.mrf.mxu1 }
  0xda   :  { %466 = vst [vmem:[%s793_s2 + $0x70] sm:$0xff] %v450_v33  ;;  %v443_v36 = vpack.c.bf16 %v314_v35, %v265_v34 }
  0xdc   :  { %459 = vst [vmem:[%s793_s2 + $0x38] sm:$0xff] %v443_v36 }
  0xde   :  { %v285_v37 = vpop.f32.mrf.mxu2 }
  0xdf   :  { %v334_v38 = vpop.f32.mrf.mxu3 }
  0xe0   :  { %v451_v39 = vpack.c.bf16 %v334_v38, %v285_v37 }
  0xe2   :  { %467 = vst [vmem:[%s793_s2 + $0x78] sm:$0xff] %v451_v39 }

// kernel: gcn_cluster_forward.8
= control target key start
LH: loop header
LB: loop body
LE: loop exit
PB: predicated region body
PF: predicated region fallthrough
CT: control target
= control target key end

     0   :  { %s823_s1 = inlined_call_operand.vmem [shape: bf16[128,256], index: 1, kind: input, shape index: {}]   ;;  %s824_s0 = inlined_call_operand.vmem [shape: bf16[128,128], index: 0, kind: input, shape index: {}]   ;;  %s825_s2 = inlined_call_operand.vmem [shape: bf16[128,256], index: 2, kind: output, shape index: {}]  }
   0x1   :  { %v594_v0 = vld [vmem:[%s823_s1 + $0x70] sm:$0xf]  ;;  %v623_v1 = vld [vmem:[%s823_s1 + $0x74] sm:$0xf0]  ;;  %v622_v2 = vld [vmem:[%s823_s1 + $0x74] sm:$0xf] }
   0x2   :  { %v595_v3 = vor.u32 %v623_v1, %v594_v0  ;;  %v596_v4 = vld [vmem:[%s823_s1 + $0x78] sm:$0xf0]  ;;  %v586_v5 = vld [vmem:[%s823_s1 + $0x60] sm:$0xf]  ;;  %v621_v6 = vld [vmem:[%s823_s1 + $0x64] sm:$0xf0] }
   0x3   :  { %v599_v7 = vor.u32 %v622_v2, %v596_v4  ;;  %v620_v8 = vld [vmem:[%s823_s1 + $0x64] sm:$0xf]  ;;  %v588_v9 = vld [vmem:[%s823_s1 + $0x68] sm:$0xf0]  ;;  %v587_v10 = vor.u32 %v621_v6, %v586_v5  ;;  %v578_v12 = vld [vmem:[%s823_s1 + $0x50] sm:$0xf] }
   0x4   :  { %239 = vmatpush.bf16.msra.mxu0 %v595_v3  ;;  %624 = vmatpush.bf16.msra.mxu2 %v595_v3  ;;  %v591_v11 = vor.u32 %v620_v8, %v588_v9  ;;  %v619_v13 = vld [vmem:[%s823_s1 + $0x54] sm:$0xf0]  ;;  %v618_v14 = vld [vmem:[%s823_s1 + $0x54] sm:$0xf]  ;;  %v580_v15 = vld [vmem:[%s823_s1 + $0x58] sm:$0xf0] }
   0x5   :  { %288 = vmatpush.bf16.msra.mxu1 %v599_v7  ;;  %632 = vmatpush.bf16.msra.mxu3 %v599_v7  ;;  %v579_v16 = vor.u32 %v619_v13, %v578_v12  ;;  %v583_v17 = vor.u32 %v618_v14, %v580_v15  ;;  %v570_v18 = vld [vmem:[%s823_s1 + $0x40] sm:$0xf]  ;;  %v617_v19 = vld [vmem:[%s823_s1 + $0x44] sm:$0xf0]  ;;  %v616_v20 = vld [vmem:[%s823_s1 + $0x44] sm:$0xf] }
   0x6   :  { %v572_v21 = vld [vmem:[%s823_s1 + $0x48] sm:$0xf0]  ;;  %v571_v22 = vor.u32 %v617_v19, %v570_v18  ;;  %v562_v24 = vld [vmem:[%s823_s1 + $0x30] sm:$0xf]  ;;  %v615_v25 = vld [vmem:[%s823_s1 + $0x34] sm:$0xf0] }
   0x7   :  { %v575_v23 = vor.u32 %v616_v20, %v572_v21  ;;  %v614_v26 = vld [vmem:[%s823_s1 + $0x34] sm:$0xf]  ;;  %v564_v27 = vld [vmem:[%s823_s1 + $0x38] sm:$0xf0]  ;;  %v563_v28 = vor.u32 %v615_v25, %v562_v24  ;;  %v554_v30 = vld [vmem:[%s823_s1 + $0x20] sm:$0xf] }
   0x8   :  { %240 = vmatpush.bf16.msra.mxu0 %v587_v10  ;;  %625 = vmatpush.bf16.msra.mxu2 %v587_v10  ;;  %v567_v29 = vor.u32 %v614_v26, %v564_v27  ;;  %v613_v31 = vld [vmem:[%s823_s1 + $0x24] sm:$0xf0]  ;;  %v612_v32 = vld [vmem:[%s823_s1 + $0x24] sm:$0xf]  ;;  %v556_v33 = vld [vmem:[%s823_s1 + $0x28] sm:$0xf0] }
   0x9   :  { %289 = vmatpush.bf16.msra.mxu1 %v591_v11  ;;  %633 = vmatpush.bf16.msra.mxu3 %v591_v11  ;;  %v555_v34 = vor.u32 %v613_v31, %v554_v30  ;;  %v559_v35 = vor.u32 %v612_v32, %v556_v33  ;;  %v546_v36 = vld [vmem:[%s823_s1 + $0x10] sm:$0xf]  ;;  %v611_v37 = vld [vmem:[%s823_s1 + $0x14] sm:$0xf0]  ;;  %v610_v38 = vld [vmem:[%s823_s1 + $0x14] sm:$0xf] }
   0xa   :  { %v548_v39 = vld [vmem:[%s823_s1 + $0x18] sm:$0xf0]  ;;  %v547_v40 = vor.u32 %v611_v37, %v546_v36  ;;  %v538_v42 = vld [vmem:[%s823_s1] sm:$0xf]  ;;  %v609_v43 = vld [vmem:[%s823_s1 + $0x4] sm:$0xf0] }
   0xb   :  { %v551_v41 = vor.u32 %v610_v38, %v548_v39  ;;  %v608_v44 = vld [vmem:[%s823_s1 + $0x4] sm:$0xf]  ;;  %v540_v45 = vld [vmem:[%s823_s1 + $0x8] sm:$0xf0]  ;;  %v539_v46 = vor.u32 %v609_v43, %v538_v42  ;;  %v602_v52 = vld [vmem:[%s824_s0 + $0x10] sm:$0xff] }
   0xc   :  { %241 = vmatpush.bf16.msra.mxu0 %v579_v16  ;;  %626 = vmatpush.bf16.msra.mxu2 %v579_v16  ;;  %v543_v47 = vor.u32 %v608_v44, %v540_v45  ;;  %v600_v48 = vld [vmem:[%s824_s0] sm:$0xff]  ;;  %v601_v50 = vld [vmem:[%s824_s0 + $0x8] sm:$0xff]  ;;  %v606_v53 = vld [vmem:[%s824_s0 + $0x30] sm:$0xff] }
   0xd   :  { %290 = vmatpush.bf16.msra.mxu1 %v583_v17  ;;  %634 = vmatpush.bf16.msra.mxu3 %v583_v17  ;;  %v604_v49 = vld [vmem:[%s824_s0 + $0x20] sm:$0xff]  ;;  %v605_v51 = vld [vmem:[%s824_s0 + $0x28] sm:$0xff]  ;;  %v603_v54 = vld [vmem:[%s824_s0 + $0x18] sm:$0xff] }
   0xe   :  { %v607_v55 = vld [vmem:[%s824_s0 + $0x38] sm:$0xff] }
  0x10   :  { %242 = vmatpush.bf16.msra.mxu0 %v571_v22  ;;  %627 = vmatpush.bf16.msra.mxu2 %v571_v22 }
  0x11   :  { %291 = vmatpush.bf16.msra.mxu1 %v575_v23  ;;  %635 = vmatpush.bf16.msra.mxu3 %v575_v23 }
  0x14   :  { %243 = vmatpush.bf16.msra.mxu0 %v563_v28  ;;  %628 = vmatpush.bf16.msra.mxu2 %v563_v28 }
  0x15   :  { %292 = vmatpush.bf16.msra.mxu1 %v567_v29  ;;  %636 = vmatpush.bf16.msra.mxu3 %v567_v29 }
  0x18   :  { %244 = vmatpush.bf16.msra.mxu0 %v555_v34  ;;  %629 = vmatpush.bf16.msra.mxu2 %v555_v34 }
  0x19   :  { %293 = vmatpush.bf16.msra.mxu1 %v559_v35  ;;  %637 = vmatpush.bf16.msra.mxu3 %v559_v35 }
  0x1c   :  { %245 = vmatpush.bf16.msra.mxu0 %v547_v40  ;;  %630 = vmatpush.bf16.msra.mxu2 %v547_v40 }
  0x1d   :  { %294 = vmatpush.bf16.msra.mxu1 %v551_v41  ;;  %638 = vmatpush.bf16.msra.mxu3 %v551_v41 }
  0x20   :  { %246 = vmatpush.bf16.msra.mxu0 %v539_v46  ;;  %631 = vmatpush.bf16.msra.mxu2 %v539_v46 }
  0x21   :  { %295 = vmatpush.bf16.msra.mxu1 %v543_v47  ;;  %639 = vmatpush.bf16.msra.mxu3 %v543_v47 }
  0x23   :  { %247 = vmatmul.bf16.vlgmr.msra.gmra.mxu0 %v600_v48  ;;  %267 = vmatmul.bf16.vlgmr.msra.gmra.mxu2 %v604_v49 }
  0x24   :  { %296 = vmatmul.bf16.vlgmr.msra.gmra.mxu1 %v600_v48  ;;  %316 = vmatmul.bf16.vlgmr.msra.gmra.mxu3 %v604_v49 }
  0x33   :  { %252 = vmatmul.bf16.gmra.mxu0 %v601_v50  ;;  %272 = vmatmul.bf16.gmra.mxu2 %v605_v51 }
  0x34   :  { %301 = vmatmul.bf16.gmra.mxu1 %v601_v50  ;;  %321 = vmatmul.bf16.gmra.mxu3 %v605_v51 }
  0x43   :  { %257 = vmatmul.bf16.gmra.mxu0 %v602_v52  ;;  %277 = vmatmul.bf16.gmra.mxu2 %v606_v53 }
  0x44   :  { %306 = vmatmul.bf16.gmra.mxu1 %v602_v52  ;;  %326 = vmatmul.bf16.gmra.mxu3 %v606_v53 }
  0x53   :  { %262 = vmatmul.bf16.gmra.mxu0 %v603_v54  ;;  %282 = vmatmul.bf16.gmra.mxu2 %v607_v55 }
  0x54   :  { %311 = vmatmul.bf16.gmra.mxu1 %v603_v54  ;;  %331 = vmatmul.bf16.gmra.mxu3 %v607_v55 }
  0xa0   :  { %v248_v56 = vpop.f32.mrf.mxu0 }
  0xa1   :  { %v436_v57 = vmax.f32 %v248_v56, 0.0  ;;  %v297_v58 = vpop.f32.mrf.mxu1 }
  0xa2   :  { %v437_v59 = vmax.f32 %v297_v58, 0.0 }
  0xa4   :  { %v468_v60 = vpack.c.bf16 %v437_v59, %v436_v57 }
  0xa6   :  { %484 = vst [vmem:[%s825_s2] sm:$0xff] %v468_v60  ;;  %v268_v61 = vpop.f32.mrf.mxu2 }
  0xa7   :  { %v452_v62 = vmax.f32 %v268_v61, 0.0  ;;  %v317_v63 = vpop.f32.mrf.mxu3 }
  0xa8   :  { %v453_v0 = vmax.f32 %v317_v63, 0.0  ;;  %v250_v1 = vpop.f32.mrf.mxu0 }
  0xa9   :  { %v438_v2 = vmax.f32 %v250_v1, 0.0  ;;  %v299_v3 = vpop.f32.mrf.mxu1 }
  0xaa   :  { %v476_v4 = vpack.c.bf16 %v453_v0, %v452_v62  ;;  %v439_v5 = vmax.f32 %v299_v3, 0.0 }
  0xac   :  { %492 = vst [vmem:[%s825_s2 + $0x40] sm:$0xff] %v476_v4  ;;  %v469_v6 = vpack.c.bf16 %v439_v5, %v438_v2 }
  0xae   :  { %485 = vst [vmem:[%s825_s2 + $0x8] sm:$0xff] %v469_v6  ;;  %v270_v7 = vpop.f32.mrf.mxu2 }
  0xaf   :  { %v454_v8 = vmax.f32 %v270_v7, 0.0  ;;  %v319_v9 = vpop.f32.mrf.mxu3 }
  0xb0   :  { %v455_v10 = vmax.f32 %v319_v9, 0.0  ;;  %v253_v11 = vpop.f32.mrf.mxu0 }
  0xb1   :  { %v440_v12 = vmax.f32 %v253_v11, 0.0  ;;  %v302_v13 = vpop.f32.mrf.mxu1 }
  0xb2   :  { %v477_v14 = vpack.c.bf16 %v455_v10, %v454_v8  ;;  %v441_v15 = vmax.f32 %v302_v13, 0.0 }
  0xb4   :  { %493 = vst [vmem:[%s825_s2 + $0x48] sm:$0xff] %v477_v14  ;;  %v470_v16 = vpack.c.bf16 %v441_v15, %v440_v12 }
  0xb6   :  { %486 = vst [vmem:[%s825_s2 + $0x10] sm:$0xff] %v470_v16  ;;  %v273_v17 = vpop.f32.mrf.mxu2 }
  0xb7   :  { %v456_v18 = vmax.f32 %v273_v17, 0.0  ;;  %v322_v19 = vpop.f32.mrf.mxu3 }
  0xb8   :  { %v457_v20 = vmax.f32 %v322_v19, 0.0  ;;  %v255_v21 = vpop.f32.mrf.mxu0 }
  0xb9   :  { %v442_v22 = vmax.f32 %v255_v21, 0.0  ;;  %v304_v23 = vpop.f32.mrf.mxu1 }
  0xba   :  { %v478_v24 = vpack.c.bf16 %v457_v20, %v456_v18  ;;  %v443_v25 = vmax.f32 %v304_v23, 0.0 }
  0xbc   :  { %494 = vst [vmem:[%s825_s2 + $0x50] sm:$0xff] %v478_v24  ;;  %v471_v26 = vpack.c.bf16 %v443_v25, %v442_v22 }
  0xbe   :  { %487 = vst [vmem:[%s825_s2 + $0x18] sm:$0xff] %v471_v26  ;;  %v275_v27 = vpop.f32.mrf.mxu2 }
  0xbf   :  { %v458_v28 = vmax.f32 %v275_v27, 0.0  ;;  %v324_v29 = vpop.f32.mrf.mxu3 }
  0xc0   :  { %v459_v30 = vmax.f32 %v324_v29, 0.0  ;;  %v258_v31 = vpop.f32.mrf.mxu0 }
  0xc1   :  { %v444_v32 = vmax.f32 %v258_v31, 0.0  ;;  %v307_v33 = vpop.f32.mrf.mxu1 }
  0xc2   :  { %v479_v34 = vpack.c.bf16 %v459_v30, %v458_v28  ;;  %v445_v35 = vmax.f32 %v307_v33, 0.0 }
  0xc4   :  { %495 = vst [vmem:[%s825_s2 + $0x58] sm:$0xff] %v479_v34  ;;  %v472_v36 = vpack.c.bf16 %v445_v35, %v444_v32 }
  0xc6   :  { %488 = vst [vmem:[%s825_s2 + $0x20] sm:$0xff] %v472_v36  ;;  %v278_v37 = vpop.f32.mrf.mxu2 }
  0xc7   :  { %v460_v38 = vmax.f32 %v278_v37, 0.0  ;;  %v327_v39 = vpop.f32.mrf.mxu3 }
  0xc8   :  { %v461_v40 = vmax.f32 %v327_v39, 0.0  ;;  %v260_v41 = vpop.f32.mrf.mxu0 }
  0xc9   :  { %v446_v42 = vmax.f32 %v260_v41, 0.0  ;;  %v309_v43 = vpop.f32.mrf.mxu1 }
  0xca   :  { %v480_v44 = vpack.c.bf16 %v461_v40, %v460_v38  ;;  %v447_v45 = vmax.f32 %v309_v43, 0.0 }
  0xcc   :  { %496 = vst [vmem:[%s825_s2 + $0x60] sm:$0xff] %v480_v44  ;;  %v473_v46 = vpack.c.bf16 %v447_v45, %v446_v42 }
  0xce   :  { %489 = vst [vmem:[%s825_s2 + $0x28] sm:$0xff] %v473_v46  ;;  %v280_v47 = vpop.f32.mrf.mxu2 }
  0xcf   :  { %v462_v48 = vmax.f32 %v280_v47, 0.0  ;;  %v329_v49 = vpop.f32.mrf.mxu3 }
  0xd0   :  { %v463_v50 = vmax.f32 %v329_v49, 0.0  ;;  %v263_v51 = vpop.f32.mrf.mxu0 }
  0xd1   :  { %v448_v52 = vmax.f32 %v263_v51, 0.0  ;;  %v312_v53 = vpop.f32.mrf.mxu1 }
  0xd2   :  { %v481_v54 = vpack.c.bf16 %v463_v50, %v462_v48  ;;  %v449_v55 = vmax.f32 %v312_v53, 0.0 }
  0xd4   :  { %497 = vst [vmem:[%s825_s2 + $0x68] sm:$0xff] %v481_v54  ;;  %v474_v56 = vpack.c.bf16 %v449_v55, %v448_v52 }
  0xd6   :  { %490 = vst [vmem:[%s825_s2 + $0x30] sm:$0xff] %v474_v56  ;;  %v283_v57 = vpop.f32.mrf.mxu2 }
  0xd7   :  { %v464_v58 = vmax.f32 %v283_v57, 0.0  ;;  %v332_v59 = vpop.f32.mrf.mxu3 }
  0xd8   :  { %v465_v60 = vmax.f32 %v332_v59, 0.0  ;;  %v265_v61 = vpop.f32.mrf.mxu0 }
  0xd9   :  { %v450_v62 = vmax.f32 %v265_v61, 0.0  ;;  %v314_v63 = vpop.f32.mrf.mxu1 }
  0xda   :  { %v482_v0 = vpack.c.bf16 %v465_v60, %v464_v58  ;;  %v451_v1 = vmax.f32 %v314_v63, 0.0 }
  0xdc   :  { %498 = vst [vmem:[%s825_s2 + $0x70] sm:$0xff] %v482_v0  ;;  %v475_v2 = vpack.c.bf16 %v451_v1, %v450_v62 }
  0xde   :  { %491 = vst [vmem:[%s825_s2 + $0x38] sm:$0xff] %v475_v2  ;;  %v285_v3 = vpop.f32.mrf.mxu2 }
  0xdf   :  { %v466_v4 = vmax.f32 %v285_v3, 0.0  ;;  %v334_v5 = vpop.f32.mrf.mxu3 }
  0xe0   :  { %v467_v6 = vmax.f32 %v334_v5, 0.0 }
  0xe2   :  { %v483_v7 = vpack.c.bf16 %v467_v6, %v466_v4 }
  0xe4   :  { %499 = vst [vmem:[%s825_s2 + $0x78] sm:$0xff] %v483_v7 }

// kernel: gcn_cluster_forward.9
= control target key start
LH: loop header
LB: loop body
LE: loop exit
PB: predicated region body
PF: predicated region fallthrough
CT: control target
= control target key end

     0   :  { %s1353_s9 = smov 0   ;;  %s1355_s10 = smov 0   ;;  %s1637_s0 = inlined_call_operand.vmem [shape: bf16[128,256], index: 0, kind: input, shape index: {}]   ;;  %s1638_s1 = inlined_call_operand.vmem [shape: bf16[256,384], index: 1, kind: input, shape index: {}]   ;;  %s1639_s2 = inlined_call_operand.vmem [shape: bf16[128,384], index: 2, kind: output, shape index: {}]  }
   0x1   :  { %s1357_s11 = smov 0   ;;  %s1359_s12 = smov 0  }
   0x2   :  { %s1361_s13 = smov 0  }
   0x3 LB: > { %s27_s14 = sadd.s32 1, %s1332_s12  ;;  %s1021_s15 = sadd.s32 4294967295, %s1336_s13   ;;  %s1336_s13 = sphi %s1361_s13, %s12_s13   ;;  %s1332_s12 = sphi %s1359_s12, %s1644_s12   ;;  %s1328_s11 = sphi %s1357_s11, %s1643_s11   ;;  %s1324_s10 = sphi %s1355_s10, %s1642_s10   ;;  %s1320_s9 = sphi %s1353_s9, %s1641_s9  }
   0x4   : > { %p29_p0 = scmp.ge.s32.totalorder %s27_s14, 3  ;;  %p75_p1 = scmp.ne.s32.totalorder %s1324_s10, %s1320_s9 }
   0x5   : > { %p76_p2 = scmp.eq.s32.totalorder %s1336_s13, 0  ;;  %p107_p4 = scmp.eq.s32.totalorder %s1021_s15, 2 }
   0x6   : > { %s1646_s14 = smov (%p29_p0, %s27_s14), 0  ;;  %s68_s17 = sadd.s32 1, %s1324_s10 }
   0x7   : > { %p77_p3 = por %p76_p2, %p75_p1  ;;  %s64_s16 = ssub.s32 %s1332_s12, %s1646_s14 }
   0x8   : > { %p66_p5 = scmp.eq.s32.totalorder %s64_s16, 0  ;;  %p1388_p6 = por %p107_p4, %p75_p1 }
   0x9   : > { %p1025_p7 = scmp.ge.s32.totalorder %s1336_s13, 3 }
   0xa   : > { %s1393_s19 = scalar_select %p66_p5, %s1324_s10, %s68_s17  }
   0xb   : > { %144 = sbr.rel (%p1025_p7) target bundleno = 52 (0x34), region = 20 }
  0x10   : > { %147 = sbr.rel (!%p77_p3) target bundleno = 52 (0x34), region = 24  ;;  %s149_s20 = sand.u32 (%p77_p3), 1, %s1324_s10  }
  0x11   : > { %s1027_s21 = sshll.u32 (%p77_p3), %s1332_s12, 2  ;;  %s1026_s22 = sshll.u32 (%p77_p3), %s149_s20, 7 }
  0x12   : > { %s1401_s25 = scalar_lea.vmem (%p77_p3), %s1638_s1, %s1027_s21  ;;  %s1405_s26 = scalar_lea.vmem (%p77_p3), [#allocation3], %s1026_s22 }
  0x13   : > { %v173_v0 = vld [vmem:[%s1401_s25] sm:$0xf] (%p77_p3)  ;;  %v175_v1 = vld [vmem:[%s1401_s25 + $0xc] sm:$0xf] (%p77_p3)  ;;  %v177_v2 = vld [vmem:[%s1401_s25 + $0x18] sm:$0xf] (%p77_p3) }
  0x14   : > { %174 = vst [vmem:[%s1405_s26] sm:$0xf] (%p77_p3), %v173_v0  ;;  %v179_v3 = vld [vmem:[%s1401_s25 + $0x24] sm:$0xf] (%p77_p3)  ;;  %v181_v4 = vld [vmem:[%s1401_s25 + $0x30] sm:$0xf] (%p77_p3) }
  0x15   : > { %176 = vst [vmem:[%s1405_s26 + $0x4] sm:$0xf] %v175_v1  ;;  %v183_v5 = vld [vmem:[%s1401_s25 + $0x3c] sm:$0xf]  ;;  %v185_v6 = vld [vmem:[%s1401_s25 + $0x48] sm:$0xf] }
  0x16   : > { %178 = vst [vmem:[%s1405_s26 + $0x8] sm:$0xf] %v177_v2  ;;  %v187_v7 = vld [vmem:[%s1401_s25 + $0x54] sm:$0xf]  ;;  %v189_v8 = vld [vmem:[%s1401_s25 + $0x60] sm:$0xf] }
  0x17   : > { %180 = vst [vmem:[%s1405_s26 + $0xc] sm:$0xf] %v179_v3  ;;  %v191_v9 = vld [vmem:[%s1401_s25 + $0x6c] sm:$0xf]  ;;  %v193_v10 = vld [vmem:[%s1401_s25 + $0x78] sm:$0xf] }
  0x18   : > { %182 = vst [vmem:[%s1405_s26 + $0x10] sm:$0xf] %v181_v4  ;;  %v195_v11 = vld [vmem:[%s1401_s25 + $0x84] sm:$0xf]  ;;  %v197_v12 = vld [vmem:[%s1401_s25 + $0x90] sm:$0xf] }
  0x19   : > { %184 = vst [vmem:[%s1405_s26 + $0x14] sm:$0xf] %v183_v5  ;;  %v199_v13 = vld [vmem:[%s1401_s25 + $0x9c] sm:$0xf]  ;;  %v201_v14 = vld [vmem:[%s1401_s25 + $0xa8] sm:$0xf] }
  0x1a   : > { %186 = vst [vmem:[%s1405_s26 + $0x18] sm:$0xf] %v185_v6  ;;  %v203_v15 = vld [vmem:[%s1401_s25 + $0xb4] sm:$0xf]  ;;  %v205_v16 = vld [vmem:[%s1401_s25 + $0xc0] sm:$0xf] }
  0x1b   : > { %188 = vst [vmem:[%s1405_s26 + $0x1c] sm:$0xf] %v187_v7  ;;  %v207_v17 = vld [vmem:[%s1401_s25 + $0xcc] sm:$0xf]  ;;  %v209_v18 = vld [vmem:[%s1401_s25 + $0xd8] sm:$0xf] }
  0x1c   : > { %190 = vst [vmem:[%s1405_s26 + $0x20] sm:$0xf] %v189_v8  ;;  %v211_v19 = vld [vmem:[%s1401_s25 + $0xe4] sm:$0xf]  ;;  %v213_v20 = vld [vmem:[%s1401_s25 + $0xf0] sm:$0xf] }
  0x1d   : > { %192 = vst [vmem:[%s1405_s26 + $0x24] sm:$0xf] %v191_v9  ;;  %v215_v21 = vld [vmem:[%s1401_s25 + $0xfc] sm:$0xf]  ;;  %v217_v22 = vld [vmem:[%s1401_s25 + $0x108] sm:$0xf] }
  0x1e   : > { %194 = vst [vmem:[%s1405_s26 + $0x28] sm:$0xf] %v193_v10  ;;  %v219_v23 = vld [vmem:[%s1401_s25 + $0x114] sm:$0xf]  ;;  %v221_v24 = vld [vmem:[%s1401_s25 + $0x120] sm:$0xf] }
  0x1f   : > { %196 = vst [vmem:[%s1405_s26 + $0x2c] sm:$0xf] %v195_v11  ;;  %v223_v25 = vld [vmem:[%s1401_s25 + $0x12c] sm:$0xf]  ;;  %v225_v26 = vld [vmem:[%s1401_s25 + $0x138] sm:$0xf] }
  0x20   : > { %198 = vst [vmem:[%s1405_s26 + $0x30] sm:$0xf] %v197_v12  ;;  %v227_v27 = vld [vmem:[%s1401_s25 + $0x144] sm:$0xf]  ;;  %v229_v28 = vld [vmem:[%s1401_s25 + $0x150] sm:$0xf] }
  0x21   : > { %200 = vst [vmem:[%s1405_s26 + $0x34] sm:$0xf] %v199_v13  ;;  %v231_v29 = vld [vmem:[%s1401_s25 + $0x15c] sm:$0xf]  ;;  %v233_v30 = vld [vmem:[%s1401_s25 + $0x168] sm:$0xf] }
  0x22   : > { %202 = vst [vmem:[%s1405_s26 + $0x38] sm:$0xf] %v201_v14  ;;  %v235_v31 = vld [vmem:[%s1401_s25 + $0x174] sm:$0xf] }
  0x23   : > { %204 = vst [vmem:[%s1405_s26 + $0x3c] sm:$0xf] %v203_v15 }
  0x24   : > { %206 = vst [vmem:[%s1405_s26 + $0x40] sm:$0xf] %v205_v16 }
  0x25   : > { %208 = vst [vmem:[%s1405_s26 + $0x44] sm:$0xf] %v207_v17 }
  0x26   : > { %210 = vst [vmem:[%s1405_s26 + $0x48] sm:$0xf] %v209_v18 }
  0x27   : > { %212 = vst [vmem:[%s1405_s26 + $0x4c] sm:$0xf] %v211_v19 }
  0x28   : > { %214 = vst [vmem:[%s1405_s26 + $0x50] sm:$0xf] %v213_v20 }
  0x29   : > { %216 = vst [vmem:[%s1405_s26 + $0x54] sm:$0xf] %v215_v21 }
  0x2a   : > { %218 = vst [vmem:[%s1405_s26 + $0x58] sm:$0xf] %v217_v22 }
  0x2b   : > { %220 = vst [vmem:[%s1405_s26 + $0x5c] sm:$0xf] %v219_v23 }
  0x2c   : > { %222 = vst [vmem:[%s1405_s26 + $0x60] sm:$0xf] %v221_v24 }
  0x2d   : > { %224 = vst [vmem:[%s1405_s26 + $0x64] sm:$0xf] %v223_v25 }
  0x2e   : > { %226 = vst [vmem:[%s1405_s26 + $0x68] sm:$0xf] %v225_v26 }
  0x2f   : > { %228 = vst [vmem:[%s1405_s26 + $0x6c] sm:$0xf] %v227_v27 }
  0x30   : > { %230 = vst [vmem:[%s1405_s26 + $0x70] sm:$0xf] %v229_v28 }
  0x31   : > { %232 = vst [vmem:[%s1405_s26 + $0x74] sm:$0xf] %v231_v29 }
  0x32   : > { %234 = vst [vmem:[%s1405_s26 + $0x78] sm:$0xf] %v233_v30 }
  0x33   : > { %236 = vst [vmem:[%s1405_s26 + $0x7c] sm:$0xf] %v235_v31 }
  0x34 PF: > { %p1028_p8 = scmp.ge.s32.totalorder %s1336_s13, 1  ;;  %p323_p9 = scmp.lt.s32.totalorder %s1336_s13, 4 }
  0x36   : > { %p324_p10 = pnand %p1028_p8, %p323_p9 }
  0x37   : > { %s330_s27 = sand.u32 (!%p324_p10), 1, %s1320_s9  }
  0x38   : > { %327 = sbr.rel (%p324_p10) target bundleno = 296 (0x128), region = 65  ;;  %s1029_s28 = sshll.u32 (!%p324_p10), %s330_s27, 7 }
  0x39   : > { %s1474_s29 = scalar_lea.vmem (!%p324_p10), [#allocation3], %s1029_s28  ;;  %s1030_s15 = sshll.u32 (!%p324_p10), %s330_s27, 6 }
  0x3a   : > { %s1590_s16 = scalar_lea.vmem (!%p324_p10), [#allocation4], %s1030_s15 }
  0x3d   : > { %v1186_v32 = vld [vmem:[%s1474_s29 + $0x38] sm:$0xff]  ;;  %v1185_v34 = vld [vmem:[%s1474_s29 + $0x30] sm:$0xff]  ;;  %v1184_v36 = vld [vmem:[%s1474_s29 + $0x28] sm:$0xff]  ;;  %s1160_s9 = sshll.u32 (%p1388_p6), %s1328_s11, 2 }
  0x3e   : > { %v1194_v33 = vld [vmem:[%s1474_s29 + $0x78] sm:$0xff]  ;;  %634 = vmatpush.bf16.msra.mxu0 %v1186_v32  ;;  %1242 = vmatpush.bf16.msra.mxu2 %v1186_v32  ;;  %v1193_v35 = vld [vmem:[%s1474_s29 + $0x70] sm:$0xff]  ;;  %v1192_v37 = vld [vmem:[%s1474_s29 + $0x68] sm:$0xff]  ;;  %s826_s20 = scalar_lea.vmem (%p1388_p6), %s1639_s2, %s1160_s9 }
  0x3f   : > { %683 = vmatpush.bf16.msra.mxu1 %v1194_v33  ;;  %1250 = vmatpush.bf16.msra.mxu3 %v1194_v33  ;;  %v1183_v38 = vld [vmem:[%s1474_s29 + $0x20] sm:$0xff]  ;;  %v1182_v40 = vld [vmem:[%s1474_s29 + $0x18] sm:$0xff]  ;;  %v1181_v42 = vld [vmem:[%s1474_s29 + $0x10] sm:$0xff] }
  0x40   : > { %v1191_v39 = vld [vmem:[%s1474_s29 + $0x60] sm:$0xff]  ;;  %v1190_v41 = vld [vmem:[%s1474_s29 + $0x58] sm:$0xff]  ;;  %v1189_v43 = vld [vmem:[%s1474_s29 + $0x50] sm:$0xff] }
  0x41   : > { %v1180_v44 = vld [vmem:[%s1474_s29 + $0x8] sm:$0xff]  ;;  %v1033_v46 = vld [vmem:[%s1637_s0] sm:$0xf]  ;;  %v1163_v52 = vld [vmem:[%s1637_s0 + $0x4] sm:$0xf] }
  0x42   : > { %635 = vmatpush.bf16.msra.mxu0 %v1185_v34  ;;  %1243 = vmatpush.bf16.msra.mxu2 %v1185_v34  ;;  %v1188_v45 = vld [vmem:[%s1474_s29 + $0x48] sm:$0xff]  ;;  %v1179_v47 = vld [vmem:[%s1474_s29] sm:$0xff]  ;;  %v1041_v60 = vld [vmem:[%s1637_s0 + $0x10] sm:$0xf] }
  0x43   : > { %684 = vmatpush.bf16.msra.mxu1 %v1193_v35  ;;  %1251 = vmatpush.bf16.msra.mxu3 %v1193_v35  ;;  %v1187_v48 = vld [vmem:[%s1474_s29 + $0x40] sm:$0xff]  ;;  %v1164_v49 = vld [vmem:[%s1637_s0 + $0x4] sm:$0xf0]  ;;  %v1035_v53 = vld [vmem:[%s1637_s0 + $0x8] sm:$0xf0] }
  0x44   : > { %v1065_v50 = vld [vmem:[%s1637_s0 + $0x40] sm:$0xf]  ;;  %v1172_v51 = vld [vmem:[%s1637_s0 + $0x44] sm:$0xf0]  ;;  %v1171_v54 = vld [vmem:[%s1637_s0 + $0x44] sm:$0xf]  ;;  %v1034_v56 = vor.u32 %v1164_v49, %v1033_v46  ;;  %v1038_v58 = vor.u32 %v1163_v52, %v1035_v53 }
  0x45   : > { %v1067_v55 = vld [vmem:[%s1637_s0 + $0x48] sm:$0xf0]  ;;  %v1066_v57 = vor.u32 %v1172_v51, %v1065_v50  ;;  %v1166_v61 = vld [vmem:[%s1637_s0 + $0x14] sm:$0xf0]  ;;  %v1073_v62 = vld [vmem:[%s1637_s0 + $0x50] sm:$0xf] }
  0x46   : > { %636 = vmatpush.bf16.msra.mxu0 %v1184_v36  ;;  %1244 = vmatpush.bf16.msra.mxu2 %v1184_v36  ;;  %v1070_v59 = vor.u32 %v1171_v54, %v1067_v55  ;;  %v1174_v63 = vld [vmem:[%s1637_s0 + $0x54] sm:$0xf0]  ;;  %v1165_v0 = vld [vmem:[%s1637_s0 + $0x14] sm:$0xf]  ;;  %v1043_v1 = vld [vmem:[%s1637_s0 + $0x18] sm:$0xf0]  ;;  %v1042_v4 = vor.u32 %v1166_v61, %v1041_v60 }
  0x47   : > { %685 = vmatpush.bf16.msra.mxu1 %v1192_v37  ;;  %1252 = vmatpush.bf16.msra.mxu3 %v1192_v37  ;;  %v1173_v2 = vld [vmem:[%s1637_s0 + $0x54] sm:$0xf]  ;;  %v1075_v3 = vld [vmem:[%s1637_s0 + $0x58] sm:$0xf0]  ;;  %v1074_v5 = vor.u32 %v1174_v63, %v1073_v62  ;;  %v1046_v6 = vor.u32 %v1165_v0, %v1043_v1  ;;  %v1049_v8 = vld [vmem:[%s1637_s0 + $0x20] sm:$0xf] }
  0x48   : > { %v1078_v7 = vor.u32 %v1173_v2, %v1075_v3  ;;  %v1168_v9 = vld [vmem:[%s1637_s0 + $0x24] sm:$0xf0]  ;;  %v1081_v10 = vld [vmem:[%s1637_s0 + $0x60] sm:$0xf]  ;;  %v1167_v12 = vld [vmem:[%s1637_s0 + $0x24] sm:$0xf] }
  0x49   : > { %v1176_v11 = vld [vmem:[%s1637_s0 + $0x64] sm:$0xf0]  ;;  %v1051_v13 = vld [vmem:[%s1637_s0 + $0x28] sm:$0xf0]  ;;  %v1175_v14 = vld [vmem:[%s1637_s0 + $0x64] sm:$0xf]  ;;  %v1050_v16 = vor.u32 %v1168_v9, %v1049_v8 }
  0x4a   : > { %637 = vmatpush.bf16.msra.mxu0 %v1183_v38  ;;  %1245 = vmatpush.bf16.msra.mxu2 %v1183_v38  ;;  %v1083_v15 = vld [vmem:[%s1637_s0 + $0x68] sm:$0xf0]  ;;  %v1082_v17 = vor.u32 %v1176_v11, %v1081_v10  ;;  %v1054_v18 = vor.u32 %v1167_v12, %v1051_v13  ;;  %v1057_v20 = vld [vmem:[%s1637_s0 + $0x30] sm:$0xf]  ;;  %v1170_v21 = vld [vmem:[%s1637_s0 + $0x34] sm:$0xf0] }
  0x4b   : > { %686 = vmatpush.bf16.msra.mxu1 %v1191_v39  ;;  %1253 = vmatpush.bf16.msra.mxu3 %v1191_v39  ;;  %v1086_v19 = vor.u32 %v1175_v14, %v1083_v15  ;;  %v1089_v22 = vld [vmem:[%s1637_s0 + $0x70] sm:$0xf]  ;;  %v1178_v23 = vld [vmem:[%s1637_s0 + $0x74] sm:$0xf0]  ;;  %v1169_v24 = vld [vmem:[%s1637_s0 + $0x34] sm:$0xf]  ;;  %v1058_v28 = vor.u32 %v1170_v21, %v1057_v20 }
  0x4c   : > { %v1059_v25 = vld [vmem:[%s1637_s0 + $0x38] sm:$0xf0]  ;;  %v1177_v26 = vld [vmem:[%s1637_s0 + $0x74] sm:$0xf]  ;;  %v1090_v29 = vor.u32 %v1178_v23, %v1089_v22 }
  0x4d   : > { %v1091_v27 = vld [vmem:[%s1637_s0 + $0x78] sm:$0xf0]  ;;  %v1062_v30 = vor.u32 %v1169_v24, %v1059_v25 }
  0x4e   : > { %638 = vmatpush.bf16.msra.mxu0 %v1182_v40  ;;  %1246 = vmatpush.bf16.msra.mxu2 %v1182_v40  ;;  %v1094_v31 = vor.u32 %v1177_v26, %v1091_v27 }
  0x4f   : > { %687 = vmatpush.bf16.msra.mxu1 %v1190_v41  ;;  %1254 = vmatpush.bf16.msra.mxu3 %v1190_v41 }
  0x52   : > { %639 = vmatpush.bf16.msra.mxu0 %v1181_v42  ;;  %1247 = vmatpush.bf16.msra.mxu2 %v1181_v42 }
  0x53   : > { %688 = vmatpush.bf16.msra.mxu1 %v1189_v43  ;;  %1255 = vmatpush.bf16.msra.mxu3 %v1189_v43 }
  0x56   : > { %640 = vmatpush.bf16.msra.mxu0 %v1180_v44  ;;  %1248 = vmatpush.bf16.msra.mxu2 %v1180_v44 }
  0x57   : > { %689 = vmatpush.bf16.msra.mxu1 %v1188_v45  ;;  %1256 = vmatpush.bf16.msra.mxu3 %v1188_v45 }
  0x5a   : > { %641 = vmatpush.bf16.msra.mxu0 %v1179_v47  ;;  %1249 = vmatpush.bf16.msra.mxu2 %v1179_v47 }
  0x5b   : > { %690 = vmatpush.bf16.msra.mxu1 %v1187_v48  ;;  %1257 = vmatpush.bf16.msra.mxu3 %v1187_v48 }
  0x5d   : > { %642 = vmatmul.bf16.vlgmr.msra.gmra.mxu0 %v1034_v56  ;;  %662 = vmatmul.bf16.vlgmr.msra.gmra.mxu2 %v1066_v57 }
  0x5e   : > { %691 = vmatmul.bf16.vlgmr.msra.gmra.mxu1 %v1038_v58  ;;  %711 = vmatmul.bf16.vlgmr.msra.gmra.mxu3 %v1070_v59 }
  0x6d   : > { %647 = vmatmul.bf16.gmra.mxu0 %v1042_v4  ;;  %667 = vmatmul.bf16.gmra.mxu2 %v1074_v5 }
  0x6e   : > { %696 = vmatmul.bf16.gmra.mxu1 %v1046_v6  ;;  %716 = vmatmul.bf16.gmra.mxu3 %v1078_v7 }
  0x7d   : > { %652 = vmatmul.bf16.gmra.mxu0 %v1050_v16  ;;  %672 = vmatmul.bf16.gmra.mxu2 %v1082_v17 }
  0x7e   : > { %701 = vmatmul.bf16.gmra.mxu1 %v1054_v18  ;;  %721 = vmatmul.bf16.gmra.mxu3 %v1086_v19 }
  0x8d   : > { %657 = vmatmul.bf16.gmra.mxu0 %v1058_v28  ;;  %677 = vmatmul.bf16.gmra.mxu2 %v1090_v29 }
  0x8e   : > { %706 = vmatmul.bf16.gmra.mxu1 %v1062_v30  ;;  %726 = vmatmul.bf16.gmra.mxu3 %v1094_v31 }
  0xda   : > { %v643_v32 = vpop.f32.mrf.mxu0 }
  0xdb   : > { %v692_v33 = vpop.f32.mrf.mxu1 }
  0xdc   : > { %v693_v38 = vadd.f32 %v692_v33, %v643_v32 }
  0xe0   : > { %v663_v34 = vpop.f32.mrf.mxu2 }
  0xe1   : > { %v712_v35 = vpop.f32.mrf.mxu3 }
  0xe2   : > { %v645_v36 = vpop.f32.mrf.mxu0  ;;  %v713_v43 = vadd.f32 %v712_v35, %v663_v34 }
  0xe3   : > { %v694_v37 = vpop.f32.mrf.mxu1 }
  0xe4   : > { %v695_v39 = vadd.f32 %v694_v37, %v645_v36 }
  0xe6   : > { %v1198_v40 = vpack.c.bf16 %v695_v39, %v693_v38 }
  0xe8   : > { %1199 = vst [vmem:[%s1590_s16] sm:$0xff] %v1198_v40   ;;  %v665_v41 = vpop.f32.mrf.mxu2 }
  0xe9   : > { %v714_v42 = vpop.f32.mrf.mxu3 }
  0xea   : > { %v715_v44 = vadd.f32 %v714_v42, %v665_v41  ;;  %v648_v45 = vpop.f32.mrf.mxu0 }
  0xeb   : > { %v697_v46 = vpop.f32.mrf.mxu1 }
  0xec   : > { %v1218_v47 = vpack.c.bf16 %v715_v44, %v713_v43  ;;  %v698_v52 = vadd.f32 %v697_v46, %v648_v45 }
  0xee   : > { %1238 = vst [vmem:[%s1590_s16 + $0x20] sm:$0xff] %v1218_v47  }
  0xef   : > { %v843_v24 = vld [vmem:[%s1590_s16] sm:$0xf] (%p1388_p6)  ;;  %v845_v25 = vld [vmem:[%s1590_s16 + $0x4] sm:$0xf] (%p1388_p6) }
  0xf0   : > { %v668_v48 = vpop.f32.mrf.mxu2  ;;  %844 = vst [vmem:[%s826_s20] sm:$0xf] (%p1388_p6), %v843_v24 }
  0xf1   : > { %v717_v49 = vpop.f32.mrf.mxu3  ;;  %846 = vst [vmem:[%s826_s20 + $0xc] sm:$0xf] (%p1388_p6), %v845_v25 }
  0xf2   : > { %v650_v50 = vpop.f32.mrf.mxu0  ;;  %v718_v57 = vadd.f32 %v717_v49, %v668_v48 }
  0xf3   : > { %v699_v51 = vpop.f32.mrf.mxu1 }
  0xf4   : > { %v700_v53 = vadd.f32 %v699_v51, %v650_v50 }
  0xf5   : > { %v859_v32 = vld [vmem:[%s1590_s16 + $0x20] sm:$0xf] (%p1388_p6)  ;;  %v861_v33 = vld [vmem:[%s1590_s16 + $0x24] sm:$0xf] (%p1388_p6) }
  0xf6   : > { %v1203_v54 = vpack.c.bf16 %v700_v53, %v698_v52  ;;  %860 = vst [vmem:[%s826_s20 + $0x60] sm:$0xf] (%p1388_p6), %v859_v32 }
  0xf7   : > { %862 = vst [vmem:[%s826_s20 + $0x6c] sm:$0xf] (%p1388_p6), %v861_v33 }
  0xf8   : > { %1235 = vst [vmem:[%s1590_s16 + $0x8] sm:$0xff] %v1203_v54   ;;  %v670_v55 = vpop.f32.mrf.mxu2 }
  0xf9   : > { %v719_v56 = vpop.f32.mrf.mxu3 }
  0xfa   : > { %v720_v58 = vadd.f32 %v719_v56, %v670_v55  ;;  %v653_v59 = vpop.f32.mrf.mxu0 }
  0xfb   : > { %v702_v60 = vpop.f32.mrf.mxu1 }
  0xfc   : > { %v1223_v61 = vpack.c.bf16 %v720_v58, %v718_v57  ;;  %v703_v2 = vadd.f32 %v702_v60, %v653_v59 }
  0xfe   : > { %1239 = vst [vmem:[%s1590_s16 + $0x28] sm:$0xff] %v1223_v61  }
  0xff   : > { %v847_v26 = vld [vmem:[%s1590_s16 + $0x8] sm:$0xf] (%p1388_p6)  ;;  %v849_v27 = vld [vmem:[%s1590_s16 + $0xc] sm:$0xf] (%p1388_p6) }
 0x100   : > { %v673_v62 = vpop.f32.mrf.mxu2  ;;  %848 = vst [vmem:[%s826_s20 + $0x18] sm:$0xf] (%p1388_p6), %v847_v26 }
 0x101   : > { %v722_v63 = vpop.f32.mrf.mxu3  ;;  %850 = vst [vmem:[%s826_s20 + $0x24] sm:$0xf] (%p1388_p6), %v849_v27 }
 0x102   : > { %v655_v0 = vpop.f32.mrf.mxu0  ;;  %v723_v7 = vadd.f32 %v722_v63, %v673_v62 }
 0x103   : > { %v704_v1 = vpop.f32.mrf.mxu1 }
 0x104   : > { %v705_v3 = vadd.f32 %v704_v1, %v655_v0 }
 0x105   : > { %v863_v34 = vld [vmem:[%s1590_s16 + $0x28] sm:$0xf] (%p1388_p6)  ;;  %v865_v35 = vld [vmem:[%s1590_s16 + $0x2c] sm:$0xf] (%p1388_p6) }
 0x106   : > { %v1208_v4 = vpack.c.bf16 %v705_v3, %v703_v2  ;;  %864 = vst [vmem:[%s826_s20 + $0x78] sm:$0xf] (%p1388_p6), %v863_v34 }
 0x107   : > { %866 = vst [vmem:[%s826_s20 + $0x84] sm:$0xf] (%p1388_p6), %v865_v35 }
 0x108   : > { %1236 = vst [vmem:[%s1590_s16 + $0x10] sm:$0xff] %v1208_v4   ;;  %v675_v5 = vpop.f32.mrf.mxu2 }
 0x109   : > { %v724_v6 = vpop.f32.mrf.mxu3 }
 0x10a   : > { %v725_v8 = vadd.f32 %v724_v6, %v675_v5  ;;  %v658_v9 = vpop.f32.mrf.mxu0 }
 0x10b   : > { %v707_v10 = vpop.f32.mrf.mxu1 }
 0x10c   : > { %v1228_v11 = vpack.c.bf16 %v725_v8, %v723_v7  ;;  %v708_v16 = vadd.f32 %v707_v10, %v658_v9 }
 0x10e   : > { %1240 = vst [vmem:[%s1590_s16 + $0x30] sm:$0xff] %v1228_v11  }
 0x10f   : > { %v851_v28 = vld [vmem:[%s1590_s16 + $0x10] sm:$0xf] (%p1388_p6)  ;;  %v853_v29 = vld [vmem:[%s1590_s16 + $0x14] sm:$0xf] (%p1388_p6) }
 0x110   : > { %v678_v12 = vpop.f32.mrf.mxu2  ;;  %852 = vst [vmem:[%s826_s20 + $0x30] sm:$0xf] (%p1388_p6), %v851_v28 }
 0x111   : > { %v727_v13 = vpop.f32.mrf.mxu3  ;;  %854 = vst [vmem:[%s826_s20 + $0x3c] sm:$0xf] (%p1388_p6), %v853_v29 }
 0x112   : > { %v660_v14 = vpop.f32.mrf.mxu0  ;;  %v728_v21 = vadd.f32 %v727_v13, %v678_v12 }
 0x113   : > { %v709_v15 = vpop.f32.mrf.mxu1 }
 0x114   : > { %v710_v17 = vadd.f32 %v709_v15, %v660_v14 }
 0x115   : > { %v867_v36 = vld [vmem:[%s1590_s16 + $0x30] sm:$0xf] (%p1388_p6)  ;;  %v869_v37 = vld [vmem:[%s1590_s16 + $0x34] sm:$0xf] (%p1388_p6) }
 0x116   : > { %v1213_v18 = vpack.c.bf16 %v710_v17, %v708_v16  ;;  %868 = vst [vmem:[%s826_s20 + $0x90] sm:$0xf] (%p1388_p6), %v867_v36 }
 0x117   : > { %870 = vst [vmem:[%s826_s20 + $0x9c] sm:$0xf] (%p1388_p6), %v869_v37 }
 0x118   : > { %1237 = vst [vmem:[%s1590_s16 + $0x18] sm:$0xff] %v1213_v18   ;;  %v680_v19 = vpop.f32.mrf.mxu2 }
 0x119   : > { %v729_v20 = vpop.f32.mrf.mxu3 }
 0x11a   : > { %v730_v22 = vadd.f32 %v729_v20, %v680_v19  ;;  %821 = sbr.rel (!%p1388_p6) target bundleno = 296 (0x128), region = 81 }
 0x11c   : > { %v1233_v23 = vpack.c.bf16 %v730_v22, %v728_v21 }
 0x11e   : > { %1241 = vst [vmem:[%s1590_s16 + $0x38] sm:$0xff] %v1233_v23  }
 0x11f   : > { %v855_v30 = vld [vmem:[%s1590_s16 + $0x18] sm:$0xf]  ;;  %v857_v31 = vld [vmem:[%s1590_s16 + $0x1c] sm:$0xf] }
 0x120   : > { %856 = vst [vmem:[%s826_s20 + $0x48] sm:$0xf] %v855_v30 }
 0x121   : > { %858 = vst [vmem:[%s826_s20 + $0x54] sm:$0xf] %v857_v31 }
 0x125   : > { %v871_v38 = vld [vmem:[%s1590_s16 + $0x38] sm:$0xf]  ;;  %v873_v39 = vld [vmem:[%s1590_s16 + $0x3c] sm:$0xf] }
 0x126   : > { %872 = vst [vmem:[%s826_s20 + $0xa8] sm:$0xf] %v871_v38 }
 0x127   : > { %874 = vst [vmem:[%s826_s20 + $0xb4] sm:$0xf] %v873_v39 }
 0x128 PF: > { %s12_s13 = sadd.s32 1, %s1336_s13   ;;  %s1641_s9 = smov %s1324_s10 }
 0x129   : > { %p9_p11 = scmp.ge.s32.totalorder %s12_s13, 5   ;;  %s1642_s10 = smov %s1393_s19 }
 0x12a   : > { %s1643_s11 = smov %s1332_s12  ;;  %s1644_s12 = smov %s1646_s14 }
 0x12b   :  { %11 = sbr.rel (!%p9_p11) target bundleno = 3 (0x3), region = 156 }

// kernel: gcn_cluster_forward.10
= control target key start
LH: loop header
LB: loop body
LE: loop exit
PB: predicated region body
PF: predicated region fallthrough
CT: control target
= control target key end

     0   :  { %s1077_s9 = smov 0   ;;  %s1079_s10 = smov 0   ;;  %s1231_s0 = inlined_call_operand.vmem [shape: bf16[128,128], index: 0, kind: input, shape index: {}]   ;;  %s1232_s1 = inlined_call_operand.vmem [shape: bf16[128,384], index: 1, kind: input, shape index: {}]   ;;  %s1233_s2 = inlined_call_operand.vmem [shape: bf16[128,384], index: 2, kind: output, shape index: {}]  }
   0x1   :  { %s1081_s11 = smov 0   ;;  %s1083_s12 = smov 0  }
   0x2   :  { %s1085_s13 = smov 0  }
   0x3 LB: > { %s27_s14 = sadd.s32 1, %s1056_s12  ;;  %s817_s15 = sadd.s32 4294967295, %s1060_s13   ;;  %s1060_s13 = sphi %s1085_s13, %s12_s13   ;;  %s1056_s12 = sphi %s1083_s12, %s1238_s12   ;;  %s1052_s11 = sphi %s1081_s11, %s1237_s11   ;;  %s1048_s10 = sphi %s1079_s10, %s1236_s10   ;;  %s1044_s9 = sphi %s1077_s9, %s1235_s9  }
   0x4   : > { %p29_p0 = scmp.ge.s32.totalorder %s27_s14, 3  ;;  %p75_p1 = scmp.ne.s32.totalorder %s1048_s10, %s1044_s9 }
   0x5   : > { %p76_p2 = scmp.eq.s32.totalorder %s1060_s13, 0  ;;  %p107_p4 = scmp.eq.s32.totalorder %s817_s15, 2 }
   0x6   : > { %s1240_s14 = smov (%p29_p0, %s27_s14), 0  ;;  %s68_s17 = sadd.s32 1, %s1048_s10 }
   0x7   : > { %p77_p3 = por %p76_p2, %p75_p1  ;;  %s64_s16 = ssub.s32 %s1056_s12, %s1240_s14 }
   0x8   : > { %p66_p5 = scmp.eq.s32.totalorder %s64_s16, 0  ;;  %p1112_p6 = por %p107_p4, %p75_p1 }
   0x9   : > { %p821_p7 = scmp.ge.s32.totalorder %s1060_s13, 3 }
   0xa   : > { %s1117_s19 = scalar_select %p66_p5, %s1048_s10, %s68_s17  }
   0xb   : > { %141 = sbr.rel (%p821_p7) target bundleno = 36 (0x24), region = 20 }
  0x10   : > { %144 = sbr.rel (!%p77_p3) target bundleno = 36 (0x24), region = 24  ;;  %s146_s20 = sand.u32 (%p77_p3), 1, %s1048_s10  }
  0x11   : > { %s823_s21 = sshll.u32 (%p77_p3), %s1056_s12, 2  ;;  %s822_s22 = sshll.u32 (%p77_p3), %s146_s20, 6 }
  0x12   : > { %s1125_s25 = scalar_lea.vmem (%p77_p3), %s1232_s1, %s823_s21  ;;  %s148_s26 = scalar_lea.vmem (%p77_p3), [#allocation3], %s822_s22 }
  0x13   : > { %v170_v0 = vld [vmem:[%s1125_s25] sm:$0xf] (%p77_p3)  ;;  %v172_v1 = vld [vmem:[%s1125_s25 + $0xc] sm:$0xf] (%p77_p3)  ;;  %v174_v2 = vld [vmem:[%s1125_s25 + $0x18] sm:$0xf] (%p77_p3) }
  0x14   : > { %171 = vst [vmem:[%s148_s26] sm:$0xf] (%p77_p3), %v170_v0  ;;  %v176_v3 = vld [vmem:[%s1125_s25 + $0x24] sm:$0xf] (%p77_p3)  ;;  %v178_v4 = vld [vmem:[%s1125_s25 + $0x30] sm:$0xf] (%p77_p3) }
  0x15   : > { %173 = vst [vmem:[%s148_s26 + $0x4] sm:$0xf] %v172_v1  ;;  %v180_v5 = vld [vmem:[%s1125_s25 + $0x3c] sm:$0xf]  ;;  %v182_v6 = vld [vmem:[%s1125_s25 + $0x48] sm:$0xf] }
  0x16   : > { %175 = vst [vmem:[%s148_s26 + $0x8] sm:$0xf] %v174_v2  ;;  %v184_v7 = vld [vmem:[%s1125_s25 + $0x54] sm:$0xf]  ;;  %v186_v8 = vld [vmem:[%s1125_s25 + $0x60] sm:$0xf] }
  0x17   : > { %177 = vst [vmem:[%s148_s26 + $0xc] sm:$0xf] %v176_v3  ;;  %v188_v9 = vld [vmem:[%s1125_s25 + $0x6c] sm:$0xf]  ;;  %v190_v10 = vld [vmem:[%s1125_s25 + $0x78] sm:$0xf] }
  0x18   : > { %179 = vst [vmem:[%s148_s26 + $0x10] sm:$0xf] %v178_v4  ;;  %v192_v11 = vld [vmem:[%s1125_s25 + $0x84] sm:$0xf]  ;;  %v194_v12 = vld [vmem:[%s1125_s25 + $0x90] sm:$0xf] }
  0x19   : > { %181 = vst [vmem:[%s148_s26 + $0x14] sm:$0xf] %v180_v5  ;;  %v196_v13 = vld [vmem:[%s1125_s25 + $0x9c] sm:$0xf]  ;;  %v198_v14 = vld [vmem:[%s1125_s25 + $0xa8] sm:$0xf] }
  0x1a   : > { %183 = vst [vmem:[%s148_s26 + $0x18] sm:$0xf] %v182_v6  ;;  %v200_v15 = vld [vmem:[%s1125_s25 + $0xb4] sm:$0xf] }
  0x1b   : > { %185 = vst [vmem:[%s148_s26 + $0x1c] sm:$0xf] %v184_v7 }
  0x1c   : > { %187 = vst [vmem:[%s148_s26 + $0x20] sm:$0xf] %v186_v8 }
  0x1d   : > { %189 = vst [vmem:[%s148_s26 + $0x24] sm:$0xf] %v188_v9 }
  0x1e   : > { %191 = vst [vmem:[%s148_s26 + $0x28] sm:$0xf] %v190_v10 }
  0x1f   : > { %193 = vst [vmem:[%s148_s26 + $0x2c] sm:$0xf] %v192_v11 }
  0x20   : > { %195 = vst [vmem:[%s148_s26 + $0x30] sm:$0xf] %v194_v12 }
  0x21   : > { %197 = vst [vmem:[%s148_s26 + $0x34] sm:$0xf] %v196_v13 }
  0x22   : > { %199 = vst [vmem:[%s148_s26 + $0x38] sm:$0xf] %v198_v14 }
  0x23   : > { %201 = vst [vmem:[%s148_s26 + $0x3c] sm:$0xf] %v200_v15 }
  0x24 PF: > { %p824_p8 = scmp.ge.s32.totalorder %s1060_s13, 1  ;;  %p256_p9 = scmp.lt.s32.totalorder %s1060_s13, 4 }
  0x26   : > { %p257_p10 = pnand %p824_p8, %p256_p9 }
  0x27   : > { %s263_s27 = sand.u32 (!%p257_p10), 1, %s1044_s9  }
  0x28   : > { %260 = sbr.rel (%p257_p10) target bundleno = 250 (0xfa), region = 65  ;;  %s1146_s28 = sshll.u32 (!%p257_p10), %s263_s27, 6 }
  0x29   : > { %s1149_s29 = scalar_lea.vmem (!%p257_p10), [#allocation3], %s1146_s28  ;;  %s1184_s25 = scalar_lea.vmem (!%p257_p10), [#allocation4], %s1146_s28 }
  0x2d   : > { %v910_v16 = vld [vmem:[%s1149_s29 + $0x38] sm:$0xff]  ;;  %v909_v17 = vld [vmem:[%s1149_s29 + $0x30] sm:$0xff]  ;;  %v908_v18 = vld [vmem:[%s1149_s29 + $0x28] sm:$0xff]  ;;  %s892_s26 = sshll.u32 (%p1112_p6), %s1052_s11, 2 }
  0x2e   : > { %466 = vmatpush.bf16.msra.mxu0 %v910_v16  ;;  %958 = vmatpush.bf16.msra.mxu1 %v910_v16  ;;  %v907_v19 = vld [vmem:[%s1149_s29 + $0x20] sm:$0xff]  ;;  %v906_v20 = vld [vmem:[%s1149_s29 + $0x18] sm:$0xff]  ;;  %v905_v21 = vld [vmem:[%s1149_s29 + $0x10] sm:$0xff] }
  0x2f   : > { %959 = vmatpush.bf16.msra.mxu2 %v910_v16  ;;  %960 = vmatpush.bf16.msra.mxu3 %v910_v16  ;;  %v904_v22 = vld [vmem:[%s1149_s29 + $0x8] sm:$0xff]  ;;  %v903_v23 = vld [vmem:[%s1149_s29] sm:$0xff]  ;;  %v897_v25 = vld [vmem:[%s1231_s0 + $0x10] sm:$0xff]  ;;  %s625_s29 = scalar_lea.vmem (%p1112_p6), %s1233_s2, %s892_s26 }
  0x30   : > { %v895_v24 = vld [vmem:[%s1231_s0] sm:$0xff]  ;;  %v901_v27 = vld [vmem:[%s1231_s0 + $0x30] sm:$0xff]  ;;  %v896_v28 = vld [vmem:[%s1231_s0 + $0x8] sm:$0xff] }
  0x31   : > { %v899_v26 = vld [vmem:[%s1231_s0 + $0x20] sm:$0xff]  ;;  %v898_v29 = vld [vmem:[%s1231_s0 + $0x18] sm:$0xff]  ;;  %v900_v30 = vld [vmem:[%s1231_s0 + $0x28] sm:$0xff] }
  0x32   : > { %467 = vmatpush.bf16.msra.mxu0 %v909_v17  ;;  %961 = vmatpush.bf16.msra.mxu1 %v909_v17  ;;  %v902_v31 = vld [vmem:[%s1231_s0 + $0x38] sm:$0xff] }
  0x33   : > { %962 = vmatpush.bf16.msra.mxu2 %v909_v17  ;;  %963 = vmatpush.bf16.msra.mxu3 %v909_v17 }
  0x36   : > { %468 = vmatpush.bf16.msra.mxu0 %v908_v18  ;;  %964 = vmatpush.bf16.msra.mxu1 %v908_v18 }
  0x37   : > { %965 = vmatpush.bf16.msra.mxu2 %v908_v18  ;;  %966 = vmatpush.bf16.msra.mxu3 %v908_v18 }
  0x3a   : > { %469 = vmatpush.bf16.msra.mxu0 %v907_v19  ;;  %967 = vmatpush.bf16.msra.mxu1 %v907_v19 }
  0x3b   : > { %968 = vmatpush.bf16.msra.mxu2 %v907_v19  ;;  %969 = vmatpush.bf16.msra.mxu3 %v907_v19 }
  0x3e   : > { %470 = vmatpush.bf16.msra.mxu0 %v906_v20  ;;  %970 = vmatpush.bf16.msra.mxu1 %v906_v20 }
  0x3f   : > { %971 = vmatpush.bf16.msra.mxu2 %v906_v20  ;;  %972 = vmatpush.bf16.msra.mxu3 %v906_v20 }
  0x42   : > { %471 = vmatpush.bf16.msra.mxu0 %v905_v21  ;;  %973 = vmatpush.bf16.msra.mxu1 %v905_v21 }
  0x43   : > { %974 = vmatpush.bf16.msra.mxu2 %v905_v21  ;;  %975 = vmatpush.bf16.msra.mxu3 %v905_v21 }
  0x46   : > { %472 = vmatpush.bf16.msra.mxu0 %v904_v22  ;;  %976 = vmatpush.bf16.msra.mxu1 %v904_v22 }
  0x47   : > { %977 = vmatpush.bf16.msra.mxu2 %v904_v22  ;;  %978 = vmatpush.bf16.msra.mxu3 %v904_v22 }
  0x4a   : > { %473 = vmatpush.bf16.msra.mxu0 %v903_v23  ;;  %979 = vmatpush.bf16.msra.mxu1 %v903_v23 }
  0x4b   : > { %980 = vmatpush.bf16.msra.mxu2 %v903_v23  ;;  %981 = vmatpush.bf16.msra.mxu3 %v903_v23 }
  0x4d   : > { %474 = vmatmul.bf16.vlgmr.msra.gmra.mxu0 %v895_v24  ;;  %484 = vmatmul.bf16.vlgmr.msra.gmra.mxu1 %v897_v25 }
  0x4e   : > { %494 = vmatmul.bf16.vlgmr.msra.gmra.mxu2 %v899_v26  ;;  %504 = vmatmul.bf16.vlgmr.msra.gmra.mxu3 %v901_v27 }
  0x5d   : > { %479 = vmatmul.bf16.gmra.mxu0 %v896_v28  ;;  %489 = vmatmul.bf16.gmra.mxu1 %v898_v29 }
  0x5e   : > { %499 = vmatmul.bf16.gmra.mxu2 %v900_v30  ;;  %509 = vmatmul.bf16.gmra.mxu3 %v902_v31 }
  0xca   : > { %v475_v32 = vpop.f32.mrf.mxu0  ;;  %v485_v33 = vpop.f32.mrf.mxu1 }
  0xcb   : > { %v566_v38 = vmax.f32 %v475_v32, 0.0  ;;  %v570_v39 = vmax.f32 %v485_v33, 0.0 }
  0xd1   : > { %v495_v34 = vpop.f32.mrf.mxu2  ;;  %v505_v35 = vpop.f32.mrf.mxu3 }
  0xd2   : > { %v477_v36 = vpop.f32.mrf.mxu0  ;;  %v487_v37 = vpop.f32.mrf.mxu1  ;;  %v574_v46 = vmax.f32 %v495_v34, 0.0  ;;  %v578_v47 = vmax.f32 %v505_v35, 0.0 }
  0xd3   : > { %v567_v40 = vmax.f32 %v477_v36, 0.0  ;;  %v571_v41 = vmax.f32 %v487_v37, 0.0 }
  0xd5   : > { %v914_v42 = vpack.c.bf16 %v567_v40, %v566_v38  ;;  %v924_v43 = vpack.c.bf16 %v571_v41, %v570_v39 }
  0xd7   : > { %915 = vst [vmem:[%s1184_s25] sm:$0xff] %v914_v42  }
  0xd8   : > { %952 = vst [vmem:[%s1184_s25 + $0x10] sm:$0xff] %v924_v43  }
  0xd9   : > { %v497_v44 = vpop.f32.mrf.mxu2  ;;  %v507_v45 = vpop.f32.mrf.mxu3 }
  0xda   : > { %v575_v48 = vmax.f32 %v497_v44, 0.0  ;;  %v579_v49 = vmax.f32 %v507_v45, 0.0  ;;  %v480_v50 = vpop.f32.mrf.mxu0  ;;  %v490_v51 = vpop.f32.mrf.mxu1 }
  0xdb   : > { %v568_v58 = vmax.f32 %v480_v50, 0.0  ;;  %v572_v59 = vmax.f32 %v490_v51, 0.0 }
  0xdc   : > { %v934_v52 = vpack.c.bf16 %v575_v48, %v574_v46  ;;  %v944_v53 = vpack.c.bf16 %v579_v49, %v578_v47 }
  0xde   : > { %954 = vst [vmem:[%s1184_s25 + $0x20] sm:$0xff] %v934_v52   ;;  %v642_v8 = vld [vmem:[%s1184_s25] sm:$0xf] (%p1112_p6)  ;;  %v644_v9 = vld [vmem:[%s1184_s25 + $0x4] sm:$0xf] (%p1112_p6) }
  0xdf   : > { %956 = vst [vmem:[%s1184_s25 + $0x30] sm:$0xff] %v944_v53   ;;  %v650_v12 = vld [vmem:[%s1184_s25 + $0x10] sm:$0xf] (%p1112_p6)  ;;  %v652_v13 = vld [vmem:[%s1184_s25 + $0x14] sm:$0xf] (%p1112_p6) }
  0xe0   : > { %643 = vst [vmem:[%s625_s29] sm:$0xf] (%p1112_p6), %v642_v8 }
  0xe1   : > { %v500_v54 = vpop.f32.mrf.mxu2  ;;  %v510_v55 = vpop.f32.mrf.mxu3  ;;  %645 = vst [vmem:[%s625_s29 + $0xc] sm:$0xf] (%p1112_p6), %v644_v9 }
  0xe2   : > { %v482_v56 = vpop.f32.mrf.mxu0  ;;  %v492_v57 = vpop.f32.mrf.mxu1  ;;  %v576_v2 = vmax.f32 %v500_v54, 0.0  ;;  %v580_v3 = vmax.f32 %v510_v55, 0.0  ;;  %651 = vst [vmem:[%s625_s29 + $0x30] sm:$0xf] (%p1112_p6), %v650_v12 }
  0xe3   : > { %v569_v60 = vmax.f32 %v482_v56, 0.0  ;;  %v573_v61 = vmax.f32 %v492_v57, 0.0  ;;  %653 = vst [vmem:[%s625_s29 + $0x3c] sm:$0xf] (%p1112_p6), %v652_v13 }
  0xe5   : > { %v919_v62 = vpack.c.bf16 %v569_v60, %v568_v58  ;;  %v929_v63 = vpack.c.bf16 %v573_v61, %v572_v59  ;;  %v658_v16 = vld [vmem:[%s1184_s25 + $0x20] sm:$0xf] (%p1112_p6)  ;;  %v660_v17 = vld [vmem:[%s1184_s25 + $0x24] sm:$0xf] (%p1112_p6) }
  0xe6   : > { %659 = vst [vmem:[%s625_s29 + $0x60] sm:$0xf] (%p1112_p6), %v658_v16  ;;  %v666_v20 = vld [vmem:[%s1184_s25 + $0x30] sm:$0xf] (%p1112_p6)  ;;  %v668_v21 = vld [vmem:[%s1184_s25 + $0x34] sm:$0xf] (%p1112_p6) }
  0xe7   : > { %951 = vst [vmem:[%s1184_s25 + $0x8] sm:$0xff] %v919_v62  }
  0xe8   : > { %953 = vst [vmem:[%s1184_s25 + $0x18] sm:$0xff] %v929_v63  }
  0xe9   : > { %v502_v0 = vpop.f32.mrf.mxu2  ;;  %v512_v1 = vpop.f32.mrf.mxu3  ;;  %661 = vst [vmem:[%s625_s29 + $0x6c] sm:$0xf] (%p1112_p6), %v660_v17 }
  0xea   : > { %v577_v4 = vmax.f32 %v502_v0, 0.0  ;;  %v581_v5 = vmax.f32 %v512_v1, 0.0  ;;  %667 = vst [vmem:[%s625_s29 + $0x90] sm:$0xf] (%p1112_p6), %v666_v20 }
  0xeb   : > { %620 = sbr.rel (!%p1112_p6) target bundleno = 250 (0xfa), region = 81  ;;  %669 = vst [vmem:[%s625_s29 + $0x9c] sm:$0xf] (%p1112_p6), %v668_v21 }
  0xec   : > { %v939_v6 = vpack.c.bf16 %v577_v4, %v576_v2  ;;  %v949_v7 = vpack.c.bf16 %v581_v5, %v580_v3 }
  0xee   : > { %955 = vst [vmem:[%s1184_s25 + $0x28] sm:$0xff] %v939_v6   ;;  %v646_v10 = vld [vmem:[%s1184_s25 + $0x8] sm:$0xf] (%p1112_p6)  ;;  %v648_v11 = vld [vmem:[%s1184_s25 + $0xc] sm:$0xf] (%p1112_p6) }
  0xef   : > { %957 = vst [vmem:[%s1184_s25 + $0x38] sm:$0xff] %v949_v7   ;;  %v654_v14 = vld [vmem:[%s1184_s25 + $0x18] sm:$0xf] (%p1112_p6)  ;;  %v656_v15 = vld [vmem:[%s1184_s25 + $0x1c] sm:$0xf] (%p1112_p6) }
  0xf0   : > { %647 = vst [vmem:[%s625_s29 + $0x18] sm:$0xf] %v646_v10 }
  0xf1   : > { %649 = vst [vmem:[%s625_s29 + $0x24] sm:$0xf] %v648_v11 }
  0xf2   : > { %655 = vst [vmem:[%s625_s29 + $0x48] sm:$0xf] %v654_v14 }
  0xf3   : > { %657 = vst [vmem:[%s625_s29 + $0x54] sm:$0xf] %v656_v15 }
  0xf5   : > { %v662_v18 = vld [vmem:[%s1184_s25 + $0x28] sm:$0xf]  ;;  %v664_v19 = vld [vmem:[%s1184_s25 + $0x2c] sm:$0xf] }
  0xf6   : > { %663 = vst [vmem:[%s625_s29 + $0x78] sm:$0xf] %v662_v18  ;;  %v670_v22 = vld [vmem:[%s1184_s25 + $0x38] sm:$0xf]  ;;  %v672_v23 = vld [vmem:[%s1184_s25 + $0x3c] sm:$0xf] }
  0xf7   : > { %665 = vst [vmem:[%s625_s29 + $0x84] sm:$0xf] %v664_v19 }
  0xf8   : > { %671 = vst [vmem:[%s625_s29 + $0xa8] sm:$0xf] %v670_v22 }
  0xf9   : > { %673 = vst [vmem:[%s625_s29 + $0xb4] sm:$0xf] %v672_v23 }
  0xfa PF: > { %s12_s13 = sadd.s32 1, %s1060_s13   ;;  %s1235_s9 = smov %s1048_s10 }
  0xfb   : > { %p9_p11 = scmp.ge.s32.totalorder %s12_s13, 5   ;;  %s1236_s10 = smov %s1117_s19 }
  0xfc   : > { %s1237_s11 = smov %s1056_s12  ;;  %s1238_s12 = smov %s1240_s14 }
  0xfd   :  { %11 = sbr.rel (!%p9_p11) target bundleno = 3 (0x3), region = 156 }

// kernel: gcn_cluster_forward.11
= control target key start
LH: loop header
LB: loop body
LE: loop exit
PB: predicated region body
PF: predicated region fallthrough
CT: control target
= control target key end

     0   :  { %s1145_s9 = smov 0   ;;  %s1147_s10 = smov 0   ;;  %s1322_s0 = inlined_call_operand.vmem [shape: bf16[128,384], index: 0, kind: input, shape index: {}]   ;;  %s1323_s1 = inlined_call_operand.vmem [shape: bf16[384,256], index: 1, kind: input, shape index: {}]   ;;  %s1324_s2 = inlined_call_operand.vmem [shape: bf16[128,256], index: 2, kind: output, shape index: {}]  }
   0x1   :  { %s1149_s11 = smov 0   ;;  %s1151_s12 = smov 0  }
   0x2   :  { %s1153_s13 = smov 0  }
   0x3 LB: > { %s24_s14 = sadd.s32 1, %s1123_s12  ;;  %p47_p1 = scmp.ne.s32.totalorder %s1115_s10, %s1111_s9  ;;  %s1127_s13 = sphi %s1153_s13, %s12_s13   ;;  %s1123_s12 = sphi %s1151_s12, %s1328_s12   ;;  %s1119_s11 = sphi %s1149_s11, %s1327_s11   ;;  %s1115_s10 = sphi %s1147_s10, %s1326_s10   ;;  %s1111_s9 = sphi %s1145_s9, %s1325_s9  }
   0x4   : > { %p25_p0 = scmp.ge.s32.totalorder %s24_s14, 3  ;;  %p48_p2 = scmp.eq.s32.totalorder %s1127_s13, 0 }
   0x5   : > { %s40_s16 = sadd.s32 1, %s1115_s10  ;;  %p897_p5 = scmp.ge.s32.totalorder %s1127_s13, 3 }
   0x6   : > { %s1330_s14 = smov (%p25_p0, %s24_s14), 0  ;;  %p49_p3 = por %p48_p2, %p47_p1 }
   0x7   : > { %s36_s15 = ssub.s32 %s1123_s12, %s1330_s14  ;;  %129 = sbr.rel (%p897_p5) target bundleno = 32 (0x20), region = 16 }
   0x8   : > { %p38_p4 = scmp.eq.s32.totalorder %s36_s15, 0 }
   0xa   : > { %s1180_s17 = scalar_select %p38_p4, %s1115_s10, %s40_s16  }
   0xc   : > { %132 = sbr.rel (!%p49_p3) target bundleno = 32 (0x20), region = 20  ;;  %s134_s18 = sand.u32 (%p49_p3), 1, %s1115_s10  }
   0xd   : > { %s899_s19 = sshll.u32 (%p49_p3), %s1123_s12, 2  ;;  %s898_s20 = sshll.u32 (%p49_p3), %s134_s18, 6 }
   0xe   : > { %s1188_s23 = scalar_lea.vmem (%p49_p3), %s1322_s0, %s899_s19  ;;  %s136_s24 = scalar_lea.vmem (%p49_p3), [#allocation3], %s898_s20 }
   0xf   : > { %v158_v0 = vld [vmem:[%s1188_s23] sm:$0xf] (%p49_p3)  ;;  %v160_v1 = vld [vmem:[%s1188_s23 + $0xc] sm:$0xf] (%p49_p3)  ;;  %v162_v2 = vld [vmem:[%s1188_s23 + $0x18] sm:$0xf] (%p49_p3) }
  0x10   : > { %159 = vst [vmem:[%s136_s24] sm:$0xf] (%p49_p3), %v158_v0  ;;  %v164_v3 = vld [vmem:[%s1188_s23 + $0x24] sm:$0xf] (%p49_p3)  ;;  %v166_v4 = vld [vmem:[%s1188_s23 + $0x30] sm:$0xf] (%p49_p3) }
  0x11   : > { %161 = vst [vmem:[%s136_s24 + $0x4] sm:$0xf] %v160_v1  ;;  %v168_v5 = vld [vmem:[%s1188_s23 + $0x3c] sm:$0xf]  ;;  %v170_v6 = vld [vmem:[%s1188_s23 + $0x48] sm:$0xf] }
  0x12   : > { %163 = vst [vmem:[%s136_s24 + $0x8] sm:$0xf] %v162_v2  ;;  %v172_v7 = vld [vmem:[%s1188_s23 + $0x54] sm:$0xf]  ;;  %v174_v8 = vld [vmem:[%s1188_s23 + $0x60] sm:$0xf] }
  0x13   : > { %165 = vst [vmem:[%s136_s24 + $0xc] sm:$0xf] %v164_v3  ;;  %v176_v9 = vld [vmem:[%s1188_s23 + $0x6c] sm:$0xf]  ;;  %v178_v10 = vld [vmem:[%s1188_s23 + $0x78] sm:$0xf] }
  0x14   : > { %167 = vst [vmem:[%s136_s24 + $0x10] sm:$0xf] %v166_v4  ;;  %v180_v11 = vld [vmem:[%s1188_s23 + $0x84] sm:$0xf]  ;;  %v182_v12 = vld [vmem:[%s1188_s23 + $0x90] sm:$0xf] }
  0x15   : > { %169 = vst [vmem:[%s136_s24 + $0x14] sm:$0xf] %v168_v5  ;;  %v184_v13 = vld [vmem:[%s1188_s23 + $0x9c] sm:$0xf]  ;;  %v186_v14 = vld [vmem:[%s1188_s23 + $0xa8] sm:$0xf] }
  0x16   : > { %171 = vst [vmem:[%s136_s24 + $0x18] sm:$0xf] %v170_v6  ;;  %v188_v15 = vld [vmem:[%s1188_s23 + $0xb4] sm:$0xf] }
  0x17   : > { %173 = vst [vmem:[%s136_s24 + $0x1c] sm:$0xf] %v172_v7 }
  0x18   : > { %175 = vst [vmem:[%s136_s24 + $0x20] sm:$0xf] %v174_v8 }
  0x19   : > { %177 = vst [vmem:[%s136_s24 + $0x24] sm:$0xf] %v176_v9 }
  0x1a   : > { %179 = vst [vmem:[%s136_s24 + $0x28] sm:$0xf] %v178_v10 }
  0x1b   : > { %181 = vst [vmem:[%s136_s24 + $0x2c] sm:$0xf] %v180_v11 }
  0x1c   : > { %183 = vst [vmem:[%s136_s24 + $0x30] sm:$0xf] %v182_v12 }
  0x1d   : > { %185 = vst [vmem:[%s136_s24 + $0x34] sm:$0xf] %v184_v13 }
  0x1e   : > { %187 = vst [vmem:[%s136_s24 + $0x38] sm:$0xf] %v186_v14 }
  0x1f   : > { %189 = vst [vmem:[%s136_s24 + $0x3c] sm:$0xf] %v188_v15 }
  0x20 PF: > { %p900_p6 = scmp.ge.s32.totalorder %s1127_s13, 1  ;;  %p259_p7 = scmp.lt.s32.totalorder %s1127_s13, 4 }
  0x22   : > { %p260_p8 = pnand %p900_p6, %p259_p7 }
  0x23   : > { %s266_s25 = sand.u32 (!%p260_p8), 1, %s1111_s9   ;;  %s902_s26 = sshll.u32 (!%p260_p8), %s1119_s11, 4 }
  0x24   : > { %263 = sbr.rel (%p260_p8) target bundleno = 324 (0x144), region = 65  ;;  %s901_s27 = sshll.u32 (!%p260_p8), %s266_s25, 6 }
  0x25   : > { %p305_p9 = scmp.lt.s32.totalorder (!%p260_p8), %s902_s26, 47  ;;  %s1215_s4 = scalar_lea.vmem (!%p260_p8), [#allocation3], %s901_s27 }
  0x26   : > { %p905_p10 = scmp.ne.s32.totalorder (!%p260_p8), %s1119_s11, 0 }
  0x29   : > { %s1332_s26 = smov (!%p305_p9, %s902_s26), 47  ;;  %330 = sbr.rel (%p905_p10) target bundleno = 79 (0x4f), region = 73 }
  0x2a   : > { %s1007_s28 = sshll.u32 %s1332_s26, 3 }
  0x2b   : > { %s1213_s3 = scalar_lea.vmem %s1323_s1, %s1007_s28 }
  0x2e   : > { %v1129_v16 = vmov 0.0  }
  0x2f   : > { %331 = vst [vmem:[#allocation2 + $0xb0] sm:$0xff] %v1129_v16 }
  0x30   : > { %332 = vst [vmem:[#allocation2] sm:$0xff] %v1129_v16 }
  0x31   : > { %333 = vst [vmem:[#allocation2 + $0xd8] sm:$0xff] %v1129_v16 }
  0x32   : > { %334 = vst [vmem:[#allocation2 + $0x18] sm:$0xff] %v1129_v16 }
  0x33   : > { %335 = vst [vmem:[#allocation2 + $0x50] sm:$0xff] %v1129_v16 }
  0x34   : > { %336 = vst [vmem:[#allocation2 + $0x68] sm:$0xff] %v1129_v16 }
  0x35   : > { %337 = vst [vmem:[#allocation2 + $0x30] sm:$0xff] %v1129_v16 }
  0x36   : > { %338 = vst [vmem:[#allocation2 + $0x48] sm:$0xff] %v1129_v16 }
  0x37   : > { %339 = vst [vmem:[#allocation2 + $0x80] sm:$0xff] %v1129_v16 }
  0x38   : > { %340 = vst [vmem:[#allocation2 + $0x88] sm:$0xff] %v1129_v16 }
  0x39   : > { %341 = vst [vmem:[#allocation2 + $0xe8] sm:$0xff] %v1129_v16 }
  0x3a   : > { %342 = vst [vmem:[#allocation2 + $0xb8] sm:$0xff] %v1129_v16 }
  0x3b   : > { %343 = vst [vmem:[#allocation2 + $0x60] sm:$0xff] %v1129_v16 }
  0x3c   : > { %344 = vst [vmem:[#allocation2 + $0xf0] sm:$0xff] %v1129_v16 }
  0x3d   : > { %345 = vst [vmem:[#allocation2 + $0x8] sm:$0xff] %v1129_v16 }
  0x3e   : > { %346 = vst [vmem:[#allocation2 + $0x78] sm:$0xff] %v1129_v16 }
  0x3f   : > { %347 = vst [vmem:[#allocation2 + $0x38] sm:$0xff] %v1129_v16 }
  0x40   : > { %348 = vst [vmem:[#allocation2 + $0x58] sm:$0xff] %v1129_v16 }
  0x41   : > { %349 = vst [vmem:[#allocation2 + $0x40] sm:$0xff] %v1129_v16 }
  0x42   : > { %350 = vst [vmem:[#allocation2 + $0xc8] sm:$0xff] %v1129_v16 }
  0x43   : > { %351 = vst [vmem:[#allocation2 + $0xe0] sm:$0xff] %v1129_v16 }
  0x44   : > { %352 = vst [vmem:[#allocation2 + $0x90] sm:$0xff] %v1129_v16 }
  0x45   : > { %353 = vst [vmem:[#allocation2 + $0x70] sm:$0xff] %v1129_v16 }
  0x46   : > { %354 = vst [vmem:[#allocation2 + $0xc0] sm:$0xff] %v1129_v16 }
  0x47   : > { %355 = vst [vmem:[#allocation2 + $0xa8] sm:$0xff] %v1129_v16 }
  0x48   : > { %356 = vst [vmem:[#allocation2 + $0xd0] sm:$0xff] %v1129_v16 }
  0x49   : > { %357 = vst [vmem:[#allocation2 + $0x10] sm:$0xff] %v1129_v16 }
  0x4a   : > { %358 = vst [vmem:[#allocation2 + $0x28] sm:$0xff] %v1129_v16 }
  0x4b   : > { %359 = vst [vmem:[#allocation2 + $0xa0] sm:$0xff] %v1129_v16 }
  0x4c   : > { %360 = vst [vmem:[#allocation2 + $0xf8] sm:$0xff] %v1129_v16 }
  0x4d   : > { %361 = vst [vmem:[#allocation2 + $0x20] sm:$0xff] %v1129_v16 }
  0x4e   : > { %362 = vst [vmem:[#allocation2 + $0x98] sm:$0xff] %v1129_v16 }
  0x4f PF: > { %v996_v17 = vld [vmem:[%s1213_s3 + $0x70] sm:$0xf]  ;;  %v1031_v18 = vld [vmem:[%s1213_s3 + $0x74] sm:$0xf0]  ;;  %v1030_v19 = vld [vmem:[%s1213_s3 + $0x74] sm:$0xf] }
  0x50   : > { %v997_v20 = vor.u32 %v1031_v18, %v996_v17  ;;  %v998_v21 = vld [vmem:[%s1213_s3 + $0x78] sm:$0xf0]  ;;  %v988_v22 = vld [vmem:[%s1213_s3 + $0x60] sm:$0xf]  ;;  %v1029_v23 = vld [vmem:[%s1213_s3 + $0x64] sm:$0xf0] }
  0x51   : > { %v1001_v24 = vor.u32 %v1030_v19, %v998_v21  ;;  %v1028_v25 = vld [vmem:[%s1213_s3 + $0x64] sm:$0xf]  ;;  %v990_v26 = vld [vmem:[%s1213_s3 + $0x68] sm:$0xf0]  ;;  %v989_v27 = vor.u32 %v1029_v23, %v988_v22  ;;  %v980_v29 = vld [vmem:[%s1213_s3 + $0x50] sm:$0xf] }
  0x52   : > { %555 = vmatpush.bf16.msra.mxu0 %v997_v20  ;;  %1032 = vmatpush.bf16.msra.mxu2 %v997_v20  ;;  %v993_v28 = vor.u32 %v1028_v25, %v990_v26  ;;  %v1027_v30 = vld [vmem:[%s1213_s3 + $0x54] sm:$0xf0]  ;;  %v1026_v31 = vld [vmem:[%s1213_s3 + $0x54] sm:$0xf]  ;;  %v982_v32 = vld [vmem:[%s1213_s3 + $0x58] sm:$0xf0] }
  0x53   : > { %604 = vmatpush.bf16.msra.mxu1 %v1001_v24  ;;  %1040 = vmatpush.bf16.msra.mxu3 %v1001_v24  ;;  %v981_v33 = vor.u32 %v1027_v30, %v980_v29  ;;  %v985_v34 = vor.u32 %v1026_v31, %v982_v32  ;;  %v972_v35 = vld [vmem:[%s1213_s3 + $0x40] sm:$0xf]  ;;  %v1025_v36 = vld [vmem:[%s1213_s3 + $0x44] sm:$0xf0]  ;;  %v1024_v37 = vld [vmem:[%s1213_s3 + $0x44] sm:$0xf] }
  0x54   : > { %v974_v38 = vld [vmem:[%s1213_s3 + $0x48] sm:$0xf0]  ;;  %v973_v39 = vor.u32 %v1025_v36, %v972_v35  ;;  %v964_v41 = vld [vmem:[%s1213_s3 + $0x30] sm:$0xf]  ;;  %v1023_v42 = vld [vmem:[%s1213_s3 + $0x34] sm:$0xf0] }
  0x55   : > { %v977_v40 = vor.u32 %v1024_v37, %v974_v38  ;;  %v1022_v43 = vld [vmem:[%s1213_s3 + $0x34] sm:$0xf]  ;;  %v966_v44 = vld [vmem:[%s1213_s3 + $0x38] sm:$0xf0]  ;;  %v965_v45 = vor.u32 %v1023_v42, %v964_v41  ;;  %v956_v47 = vld [vmem:[%s1213_s3 + $0x20] sm:$0xf] }
  0x56   : > { %556 = vmatpush.bf16.msra.mxu0 %v989_v27  ;;  %1033 = vmatpush.bf16.msra.mxu2 %v989_v27  ;;  %v969_v46 = vor.u32 %v1022_v43, %v966_v44  ;;  %v1021_v48 = vld [vmem:[%s1213_s3 + $0x24] sm:$0xf0]  ;;  %v1020_v49 = vld [vmem:[%s1213_s3 + $0x24] sm:$0xf]  ;;  %v958_v50 = vld [vmem:[%s1213_s3 + $0x28] sm:$0xf0] }
  0x57   : > { %605 = vmatpush.bf16.msra.mxu1 %v993_v28  ;;  %1041 = vmatpush.bf16.msra.mxu3 %v993_v28  ;;  %v957_v51 = vor.u32 %v1021_v48, %v956_v47  ;;  %v961_v52 = vor.u32 %v1020_v49, %v958_v50  ;;  %v948_v53 = vld [vmem:[%s1213_s3 + $0x10] sm:$0xf]  ;;  %v1019_v54 = vld [vmem:[%s1213_s3 + $0x14] sm:$0xf0]  ;;  %v1018_v55 = vld [vmem:[%s1213_s3 + $0x14] sm:$0xf] }
  0x58   : > { %v950_v56 = vld [vmem:[%s1213_s3 + $0x18] sm:$0xf0]  ;;  %v949_v57 = vor.u32 %v1019_v54, %v948_v53  ;;  %v940_v59 = vld [vmem:[%s1213_s3] sm:$0xf]  ;;  %v1017_v60 = vld [vmem:[%s1213_s3 + $0x4] sm:$0xf0] }
  0x59   : > { %v953_v58 = vor.u32 %v1018_v55, %v950_v56  ;;  %v1016_v61 = vld [vmem:[%s1213_s3 + $0x4] sm:$0xf]  ;;  %v942_v62 = vld [vmem:[%s1213_s3 + $0x8] sm:$0xf0]  ;;  %v941_v63 = vor.u32 %v1017_v60, %v940_v59  ;;  %v1010_v5 = vld [vmem:[%s1215_s4 + $0x10] sm:$0xff]  ;;  %p1002_p11 = scmp.ne.s32.totalorder %s1119_s11, 2 }
  0x5a   : > { %557 = vmatpush.bf16.msra.mxu0 %v981_v33  ;;  %1034 = vmatpush.bf16.msra.mxu2 %v981_v33  ;;  %v945_v0 = vor.u32 %v1016_v61, %v942_v62  ;;  %v1008_v1 = vld [vmem:[%s1215_s4] sm:$0xff]  ;;  %v1009_v3 = vld [vmem:[%s1215_s4 + $0x8] sm:$0xff]  ;;  %v1014_v6 = vld [vmem:[%s1215_s4 + $0x30] sm:$0xff] }
  0x5b   : > { %606 = vmatpush.bf16.msra.mxu1 %v985_v34  ;;  %1042 = vmatpush.bf16.msra.mxu3 %v985_v34  ;;  %v1012_v2 = vld [vmem:[%s1215_s4 + $0x20] sm:$0xff]  ;;  %v1013_v4 = vld [vmem:[%s1215_s4 + $0x28] sm:$0xff]  ;;  %v1011_v7 = vld [vmem:[%s1215_s4 + $0x18] sm:$0xff] }
  0x5c   : > { %v1015_v8 = vld [vmem:[%s1215_s4 + $0x38] sm:$0xff]  ;;  %v363_v9 = vld [vmem:[#allocation2 + $0xb0] sm:$0xff]  ;;  %v364_v10 = vld [vmem:[#allocation2] sm:$0xff] }
  0x5d   : > { %v379_v15 = vld [vmem:[#allocation2 + $0x38] sm:$0xff]  ;;  %v381_v27 = vld [vmem:[#allocation2 + $0x40] sm:$0xff]  ;;  %v382_v28 = vld [vmem:[#allocation2 + $0xc8] sm:$0xff] }
  0x5e   : > { %558 = vmatpush.bf16.msra.mxu0 %v973_v39  ;;  %1035 = vmatpush.bf16.msra.mxu2 %v973_v39  ;;  %v380_v16 = vld [vmem:[#allocation2 + $0x58] sm:$0xff]  ;;  %v367_v30 = vld [vmem:[#allocation2 + $0x50] sm:$0xff]  ;;  %v368_v33 = vld [vmem:[#allocation2 + $0x68] sm:$0xff] }
  0x5f   : > { %607 = vmatpush.bf16.msra.mxu1 %v977_v40  ;;  %1043 = vmatpush.bf16.msra.mxu3 %v977_v40  ;;  %v365_v18 = vld [vmem:[#allocation2 + $0xd8] sm:$0xff]  ;;  %v383_v39 = vld [vmem:[#allocation2 + $0xe0] sm:$0xff]  ;;  %v384_v40 = vld [vmem:[#allocation2 + $0x90] sm:$0xff] }
  0x60   : > { %v366_v21 = vld [vmem:[#allocation2 + $0x18] sm:$0xff]  ;;  %v369_v42 = vld [vmem:[#allocation2 + $0x30] sm:$0xff]  ;;  %v371_v54 = vld [vmem:[#allocation2 + $0x80] sm:$0xff] }
  0x62   : > { %559 = vmatpush.bf16.msra.mxu0 %v965_v45  ;;  %1036 = vmatpush.bf16.msra.mxu2 %v965_v45  ;;  %v370_v45 = vld [vmem:[#allocation2 + $0x48] sm:$0xff] }
  0x63   : > { %608 = vmatpush.bf16.msra.mxu1 %v969_v46  ;;  %1044 = vmatpush.bf16.msra.mxu3 %v969_v46 }
  0x66   : > { %560 = vmatpush.bf16.msra.mxu0 %v957_v51  ;;  %1037 = vmatpush.bf16.msra.mxu2 %v957_v51  ;;  %v385_v51 = vld [vmem:[#allocation2 + $0x70] sm:$0xff] }
  0x67   : > { %609 = vmatpush.bf16.msra.mxu1 %v961_v52  ;;  %1045 = vmatpush.bf16.msra.mxu3 %v961_v52  ;;  %v386_v52 = vld [vmem:[#allocation2 + $0xc0] sm:$0xff] }
  0x6a   : > { %561 = vmatpush.bf16.msra.mxu0 %v949_v57  ;;  %1038 = vmatpush.bf16.msra.mxu2 %v949_v57  ;;  %v372_v57 = vld [vmem:[#allocation2 + $0x88] sm:$0xff] }
  0x6b   : > { %610 = vmatpush.bf16.msra.mxu1 %v953_v58  ;;  %1046 = vmatpush.bf16.msra.mxu3 %v953_v58 }
  0x6e   : > { %562 = vmatpush.bf16.msra.mxu0 %v941_v63  ;;  %1039 = vmatpush.bf16.msra.mxu2 %v941_v63  ;;  %v387_v63 = vld [vmem:[#allocation2 + $0xa8] sm:$0xff] }
  0x6f   : > { %611 = vmatpush.bf16.msra.mxu1 %v945_v0  ;;  %1047 = vmatpush.bf16.msra.mxu3 %v945_v0  ;;  %v388_v0 = vld [vmem:[#allocation2 + $0xd0] sm:$0xff] }
  0x71   : > { %563 = vmatmul.bf16.vlgmr.msra.gmra.mxu0 %v1008_v1  ;;  %583 = vmatmul.bf16.vlgmr.msra.gmra.mxu2 %v1012_v2 }
  0x72   : > { %612 = vmatmul.bf16.vlgmr.msra.gmra.mxu1 %v1008_v1  ;;  %632 = vmatmul.bf16.vlgmr.msra.gmra.mxu3 %v1012_v2  ;;  %v373_v2 = vld [vmem:[#allocation2 + $0xe8] sm:$0xff] }
  0x81   : > { %568 = vmatmul.bf16.gmra.mxu0 %v1009_v3  ;;  %588 = vmatmul.bf16.gmra.mxu2 %v1013_v4 }
  0x82   : > { %617 = vmatmul.bf16.gmra.mxu1 %v1009_v3  ;;  %637 = vmatmul.bf16.gmra.mxu3 %v1013_v4 }
  0x91   : > { %573 = vmatmul.bf16.gmra.mxu0 %v1010_v5  ;;  %593 = vmatmul.bf16.gmra.mxu2 %v1014_v6 }
  0x92   : > { %622 = vmatmul.bf16.gmra.mxu1 %v1010_v5  ;;  %642 = vmatmul.bf16.gmra.mxu3 %v1014_v6  ;;  %v374_v5 = vld [vmem:[#allocation2 + $0xb8] sm:$0xff] }
  0xa1   : > { %578 = vmatmul.bf16.gmra.mxu0 %v1011_v7  ;;  %598 = vmatmul.bf16.gmra.mxu2 %v1015_v8 }
  0xa2   : > { %627 = vmatmul.bf16.gmra.mxu1 %v1011_v7  ;;  %647 = vmatmul.bf16.gmra.mxu3 %v1015_v8 }
  0xee   : > { %v564_v11 = vpop.f32.mrf.mxu0 }
  0xef   : > { %v653_v12 = vadd.f32 %v564_v11, %v363_v9  ;;  %v613_v13 = vpop.f32.mrf.mxu1  ;;  %v389_v11 = vld [vmem:[#allocation2 + $0x10] sm:$0xff] }
  0xf0   : > { %v654_v14 = vadd.f32 %v613_v13, %v364_v10 }
  0xf1   : > { %685 = vst [vmem:[#allocation2 + $0xb0] sm:$0xff] %v653_v12  ;;  %v390_v12 = vld [vmem:[#allocation2 + $0x28] sm:$0xff] }
  0xf2   : > { %686 = vst [vmem:[#allocation2] sm:$0xff] %v654_v14  ;;  %v375_v14 = vld [vmem:[#allocation2 + $0x60] sm:$0xff] }
  0xf4   : > { %v584_v17 = vpop.f32.mrf.mxu2 }
  0xf5   : > { %v669_v19 = vadd.f32 %v584_v17, %v379_v15  ;;  %v633_v20 = vpop.f32.mrf.mxu3  ;;  %v376_v17 = vld [vmem:[#allocation2 + $0xf0] sm:$0xff] }
  0xf6   : > { %v670_v22 = vadd.f32 %v633_v20, %v380_v16  ;;  %v566_v23 = vpop.f32.mrf.mxu0 }
  0xf7   : > { %701 = vst [vmem:[#allocation2 + $0x38] sm:$0xff] %v669_v19  ;;  %v655_v24 = vadd.f32 %v566_v23, %v365_v18  ;;  %v615_v25 = vpop.f32.mrf.mxu1  ;;  %v391_v23 = vld [vmem:[#allocation2 + $0xa0] sm:$0xff] }
  0xf8   : > { %702 = vst [vmem:[#allocation2 + $0x58] sm:$0xff] %v670_v22  ;;  %v656_v26 = vadd.f32 %v615_v25, %v366_v21 }
  0xf9   : > { %687 = vst [vmem:[#allocation2 + $0xd8] sm:$0xff] %v655_v24  ;;  %v392_v24 = vld [vmem:[#allocation2 + $0xf8] sm:$0xff] }
  0xfa   : > { %688 = vst [vmem:[#allocation2 + $0x18] sm:$0xff] %v656_v26  ;;  %v377_v26 = vld [vmem:[#allocation2 + $0x8] sm:$0xff] }
  0xfc   : > { %v586_v29 = vpop.f32.mrf.mxu2 }
  0xfd   : > { %v671_v31 = vadd.f32 %v586_v29, %v381_v27  ;;  %v635_v32 = vpop.f32.mrf.mxu3  ;;  %v378_v29 = vld [vmem:[#allocation2 + $0x78] sm:$0xff] }
  0xfe   : > { %v672_v34 = vadd.f32 %v635_v32, %v382_v28  ;;  %v569_v35 = vpop.f32.mrf.mxu0 }
  0xff   : > { %703 = vst [vmem:[#allocation2 + $0x40] sm:$0xff] %v671_v31  ;;  %v657_v36 = vadd.f32 %v569_v35, %v367_v30  ;;  %v618_v37 = vpop.f32.mrf.mxu1  ;;  %v393_v35 = vld [vmem:[#allocation2 + $0x20] sm:$0xff] }
 0x100   : > { %704 = vst [vmem:[#allocation2 + $0xc8] sm:$0xff] %v672_v34  ;;  %v658_v38 = vadd.f32 %v618_v37, %v368_v33 }
 0x101   : > { %689 = vst [vmem:[#allocation2 + $0x50] sm:$0xff] %v657_v36  ;;  %v394_v36 = vld [vmem:[#allocation2 + $0x98] sm:$0xff] }
 0x102   : > { %690 = vst [vmem:[#allocation2 + $0x68] sm:$0xff] %v658_v38 }
 0x104   : > { %v589_v41 = vpop.f32.mrf.mxu2 }
 0x105   : > { %v673_v43 = vadd.f32 %v589_v41, %v383_v39  ;;  %v638_v44 = vpop.f32.mrf.mxu3 }
 0x106   : > { %v674_v46 = vadd.f32 %v638_v44, %v384_v40  ;;  %v571_v47 = vpop.f32.mrf.mxu0 }
 0x107   : > { %705 = vst [vmem:[#allocation2 + $0xe0] sm:$0xff] %v673_v43  ;;  %v659_v48 = vadd.f32 %v571_v47, %v369_v42  ;;  %v620_v49 = vpop.f32.mrf.mxu1 }
 0x108   : > { %706 = vst [vmem:[#allocation2 + $0x90] sm:$0xff] %v674_v46  ;;  %v660_v50 = vadd.f32 %v620_v49, %v370_v45 }
 0x109   : > { %691 = vst [vmem:[#allocation2 + $0x30] sm:$0xff] %v659_v48 }
 0x10a   : > { %692 = vst [vmem:[#allocation2 + $0x48] sm:$0xff] %v660_v50 }
 0x10c   : > { %v591_v53 = vpop.f32.mrf.mxu2 }
 0x10d   : > { %v675_v55 = vadd.f32 %v591_v53, %v385_v51  ;;  %v640_v56 = vpop.f32.mrf.mxu3 }
 0x10e   : > { %v676_v58 = vadd.f32 %v640_v56, %v386_v52  ;;  %v574_v59 = vpop.f32.mrf.mxu0 }
 0x10f   : > { %707 = vst [vmem:[#allocation2 + $0x70] sm:$0xff] %v675_v55  ;;  %v661_v60 = vadd.f32 %v574_v59, %v371_v54  ;;  %v623_v61 = vpop.f32.mrf.mxu1 }
 0x110   : > { %708 = vst [vmem:[#allocation2 + $0xc0] sm:$0xff] %v676_v58  ;;  %v662_v62 = vadd.f32 %v623_v61, %v372_v57 }
 0x111   : > { %693 = vst [vmem:[#allocation2 + $0x80] sm:$0xff] %v661_v60 }
 0x112   : > { %694 = vst [vmem:[#allocation2 + $0x88] sm:$0xff] %v662_v62 }
 0x114   : > { %v594_v1 = vpop.f32.mrf.mxu2 }
 0x115   : > { %v677_v3 = vadd.f32 %v594_v1, %v387_v63  ;;  %v643_v4 = vpop.f32.mrf.mxu3 }
 0x116   : > { %v678_v6 = vadd.f32 %v643_v4, %v388_v0  ;;  %v576_v7 = vpop.f32.mrf.mxu0 }
 0x117   : > { %709 = vst [vmem:[#allocation2 + $0xa8] sm:$0xff] %v677_v3  ;;  %v663_v8 = vadd.f32 %v576_v7, %v373_v2  ;;  %v625_v9 = vpop.f32.mrf.mxu1 }
 0x118   : > { %710 = vst [vmem:[#allocation2 + $0xd0] sm:$0xff] %v678_v6  ;;  %v664_v10 = vadd.f32 %v625_v9, %v374_v5 }
 0x119   : > { %695 = vst [vmem:[#allocation2 + $0xe8] sm:$0xff] %v663_v8 }
 0x11a   : > { %696 = vst [vmem:[#allocation2 + $0xb8] sm:$0xff] %v664_v10 }
 0x11c   : > { %v596_v13 = vpop.f32.mrf.mxu2 }
 0x11d   : > { %v679_v15 = vadd.f32 %v596_v13, %v389_v11  ;;  %v645_v16 = vpop.f32.mrf.mxu3 }
 0x11e   : > { %v680_v18 = vadd.f32 %v645_v16, %v390_v12  ;;  %v579_v19 = vpop.f32.mrf.mxu0 }
 0x11f   : > { %711 = vst [vmem:[#allocation2 + $0x10] sm:$0xff] %v679_v15  ;;  %v665_v20 = vadd.f32 %v579_v19, %v375_v14  ;;  %v628_v21 = vpop.f32.mrf.mxu1 }
 0x120   : > { %712 = vst [vmem:[#allocation2 + $0x28] sm:$0xff] %v680_v18  ;;  %v666_v22 = vadd.f32 %v628_v21, %v376_v17 }
 0x121   : > { %697 = vst [vmem:[#allocation2 + $0x60] sm:$0xff] %v665_v20 }
 0x122   : > { %698 = vst [vmem:[#allocation2 + $0xf0] sm:$0xff] %v666_v22 }
 0x124   : > { %v599_v25 = vpop.f32.mrf.mxu2 }
 0x125   : > { %v681_v27 = vadd.f32 %v599_v25, %v391_v23  ;;  %v648_v28 = vpop.f32.mrf.mxu3 }
 0x126   : > { %v682_v30 = vadd.f32 %v648_v28, %v392_v24  ;;  %v581_v31 = vpop.f32.mrf.mxu0 }
 0x127   : > { %713 = vst [vmem:[#allocation2 + $0xa0] sm:$0xff] %v681_v27  ;;  %v667_v32 = vadd.f32 %v581_v31, %v377_v26  ;;  %v630_v33 = vpop.f32.mrf.mxu1 }
 0x128   : > { %714 = vst [vmem:[#allocation2 + $0xf8] sm:$0xff] %v682_v30  ;;  %v668_v34 = vadd.f32 %v630_v33, %v378_v29 }
 0x129   : > { %699 = vst [vmem:[#allocation2 + $0x8] sm:$0xff] %v667_v32 }
 0x12a   : > { %700 = vst [vmem:[#allocation2 + $0x78] sm:$0xff] %v668_v34 }
 0x12c   : > { %v601_v37 = vpop.f32.mrf.mxu2  ;;  %720 = sbr.rel (%p1002_p11) target bundleno = 324 (0x144), region = 77 }
 0x12d   : > { %v683_v38 = vadd.f32 %v601_v37, %v393_v35  ;;  %v650_v39 = vpop.f32.mrf.mxu3 }
 0x12e   : > { %v684_v40 = vadd.f32 %v650_v39, %v394_v36 }
 0x12f   : > { %715 = vst [vmem:[#allocation2 + $0x20] sm:$0xff] %v683_v38 }
 0x130   : > { %716 = vst [vmem:[#allocation2 + $0x98] sm:$0xff] %v684_v40 }
 0x131   : > { %v721_v41 = vld [vmem:[#allocation2 + $0xb0] sm:$0xff]  ;;  %v722_v42 = vld [vmem:[#allocation2] sm:$0xff]  ;;  %v723_v43 = vld [vmem:[#allocation2 + $0xd8] sm:$0xff] }
 0x132   : > { %v753_v44 = vpack.c.bf16 %v722_v42, %v721_v41  ;;  %v724_v45 = vld [vmem:[#allocation2 + $0x18] sm:$0xff]  ;;  %v725_v46 = vld [vmem:[#allocation2 + $0x50] sm:$0xff]  ;;  %v726_v47 = vld [vmem:[#allocation2 + $0x68] sm:$0xff] }
 0x133   : > { %v754_v48 = vpack.c.bf16 %v724_v45, %v723_v43  ;;  %v755_v49 = vpack.c.bf16 %v726_v47, %v725_v46  ;;  %v727_v50 = vld [vmem:[#allocation2 + $0x30] sm:$0xff]  ;;  %v728_v51 = vld [vmem:[#allocation2 + $0x48] sm:$0xff]  ;;  %v729_v52 = vld [vmem:[#allocation2 + $0x80] sm:$0xff] }
 0x134   : > { %769 = vst [vmem:[%s1324_s2] sm:$0xff] %v753_v44  ;;  %v756_v53 = vpack.c.bf16 %v728_v51, %v727_v50  ;;  %v730_v54 = vld [vmem:[#allocation2 + $0x88] sm:$0xff]  ;;  %v732_v56 = vld [vmem:[#allocation2 + $0xb8] sm:$0xff]  ;;  %v733_v59 = vld [vmem:[#allocation2 + $0x60] sm:$0xff] }
 0x135   : > { %v731_v55 = vld [vmem:[#allocation2 + $0xe8] sm:$0xff]  ;;  %770 = vst [vmem:[%s1324_s2 + $0x8] sm:$0xff] %v754_v48  ;;  %v757_v57 = vpack.c.bf16 %v730_v54, %v729_v52  ;;  %v734_v60 = vld [vmem:[#allocation2 + $0xf0] sm:$0xff]  ;;  %v736_v63 = vld [vmem:[#allocation2 + $0x78] sm:$0xff] }
 0x136   : > { %v758_v58 = vpack.c.bf16 %v732_v56, %v731_v55  ;;  %v735_v61 = vld [vmem:[#allocation2 + $0x8] sm:$0xff]  ;;  %771 = vst [vmem:[%s1324_s2 + $0x10] sm:$0xff] %v755_v49  ;;  %v759_v62 = vpack.c.bf16 %v734_v60, %v733_v59  ;;  %v737_v0 = vld [vmem:[#allocation2 + $0x38] sm:$0xff]  ;;  %v739_v3 = vld [vmem:[#allocation2 + $0x40] sm:$0xff] }
 0x137   : > { %v738_v1 = vld [vmem:[#allocation2 + $0x58] sm:$0xff]  ;;  %772 = vst [vmem:[%s1324_s2 + $0x18] sm:$0xff] %v756_v53  ;;  %v760_v2 = vpack.c.bf16 %v736_v63, %v735_v61  ;;  %v740_v4 = vld [vmem:[#allocation2 + $0xc8] sm:$0xff]  ;;  %v741_v5 = vld [vmem:[#allocation2 + $0xe0] sm:$0xff] }
 0x138   : > { %773 = vst [vmem:[%s1324_s2 + $0x20] sm:$0xff] %v757_v57  ;;  %v761_v6 = vpack.c.bf16 %v738_v1, %v737_v0  ;;  %v742_v7 = vld [vmem:[#allocation2 + $0x90] sm:$0xff]  ;;  %v744_v9 = vld [vmem:[#allocation2 + $0xc0] sm:$0xff]  ;;  %v762_v10 = vpack.c.bf16 %v740_v4, %v739_v3  ;;  %v745_v11 = vld [vmem:[#allocation2 + $0xa8] sm:$0xff] }
 0x139   : > { %v743_v8 = vld [vmem:[#allocation2 + $0x70] sm:$0xff]  ;;  %774 = vst [vmem:[%s1324_s2 + $0x28] sm:$0xff] %v758_v58  ;;  %v763_v13 = vpack.c.bf16 %v742_v7, %v741_v5  ;;  %v748_v15 = vld [vmem:[#allocation2 + $0x28] sm:$0xff]  ;;  %v749_v17 = vld [vmem:[#allocation2 + $0xa0] sm:$0xff] }
 0x13a   : > { %v746_v12 = vld [vmem:[#allocation2 + $0xd0] sm:$0xff]  ;;  %775 = vst [vmem:[%s1324_s2 + $0x30] sm:$0xff] %v759_v62  ;;  %v764_v16 = vpack.c.bf16 %v744_v9, %v743_v8  ;;  %v750_v18 = vld [vmem:[#allocation2 + $0xf8] sm:$0xff]  ;;  %v751_v20 = vld [vmem:[#allocation2 + $0x20] sm:$0xff] }
 0x13b   : > { %v747_v14 = vld [vmem:[#allocation2 + $0x10] sm:$0xff]  ;;  %776 = vst [vmem:[%s1324_s2 + $0x38] sm:$0xff] %v760_v2  ;;  %v765_v19 = vpack.c.bf16 %v746_v12, %v745_v11  ;;  %v752_v21 = vld [vmem:[#allocation2 + $0x98] sm:$0xff]  ;;  %v767_v23 = vpack.c.bf16 %v750_v18, %v749_v17 }
 0x13c   : > { %777 = vst [vmem:[%s1324_s2 + $0x40] sm:$0xff] %v761_v6  ;;  %v766_v22 = vpack.c.bf16 %v748_v15, %v747_v14  ;;  %v768_v24 = vpack.c.bf16 %v752_v21, %v751_v20 }
 0x13d   : > { %778 = vst [vmem:[%s1324_s2 + $0x48] sm:$0xff] %v762_v10 }
 0x13e   : > { %779 = vst [vmem:[%s1324_s2 + $0x50] sm:$0xff] %v763_v13 }
 0x13f   : > { %780 = vst [vmem:[%s1324_s2 + $0x58] sm:$0xff] %v764_v16 }
 0x140   : > { %781 = vst [vmem:[%s1324_s2 + $0x60] sm:$0xff] %v765_v19 }
 0x141   : > { %782 = vst [vmem:[%s1324_s2 + $0x68] sm:$0xff] %v766_v22 }
 0x142   : > { %783 = vst [vmem:[%s1324_s2 + $0x70] sm:$0xff] %v767_v23 }
 0x143   : > { %784 = vst [vmem:[%s1324_s2 + $0x78] sm:$0xff] %v768_v24 }
 0x144 PF: > { %s12_s13 = sadd.s32 1, %s1127_s13   ;;  %s1325_s9 = smov %s1115_s10 }
 0x145   : > { %p9_p12 = scmp.ge.s32.totalorder %s12_s13, 5   ;;  %s1326_s10 = smov %s1180_s17 }
 0x146   : > { %s1327_s11 = smov %s1123_s12  ;;  %s1328_s12 = smov %s1330_s14 }
 0x147   :  { %11 = sbr.rel (!%p9_p12) target bundleno = 3 (0x3), region = 115 }

// kernel: gcn_cluster_forward.13
= control target key start
LH: loop header
LB: loop body
LE: loop exit
PB: predicated region body
PF: predicated region fallthrough
CT: control target
= control target key end

     0   :  { %s889_s1 = inlined_call_operand.vmem [shape: bf16[256,128], index: 1, kind: input, shape index: {}]   ;;  %s890_s0 = inlined_call_operand.vmem [shape: bf16[128,256], index: 0, kind: input, shape index: {}]   ;;  %s891_s2 = inlined_call_operand.vmem [shape: f32[1,128], index: 2, kind: input, shape index: {}]   ;;  %s892_s3 = inlined_call_operand.vmem [shape: f32[128,128], index: 3, kind: output, shape index: {}]  }
   0x1   :  { %v630_v0 = vld [vmem:[%s889_s1 + $0x38] sm:$0xff]  ;;  %v629_v2 = vld [vmem:[%s889_s1 + $0x30] sm:$0xff]  ;;  %v628_v4 = vld [vmem:[%s889_s1 + $0x28] sm:$0xff] }
   0x2   :  { %v638_v1 = vld [vmem:[%s889_s1 + $0x78] sm:$0xff]  ;;  %274 = vmatpush.bf16.msra.mxu0 %v630_v0  ;;  %639 = vmatpush.bf16.msra.mxu2 %v630_v0  ;;  %v637_v3 = vld [vmem:[%s889_s1 + $0x70] sm:$0xff]  ;;  %v636_v5 = vld [vmem:[%s889_s1 + $0x68] sm:$0xff] }
   0x3   :  { %323 = vmatpush.bf16.msra.mxu1 %v638_v1  ;;  %647 = vmatpush.bf16.msra.mxu3 %v638_v1  ;;  %v627_v6 = vld [vmem:[%s889_s1 + $0x20] sm:$0xff]  ;;  %v626_v8 = vld [vmem:[%s889_s1 + $0x18] sm:$0xff]  ;;  %v625_v10 = vld [vmem:[%s889_s1 + $0x10] sm:$0xff] }
   0x4   :  { %v635_v7 = vld [vmem:[%s889_s1 + $0x60] sm:$0xff]  ;;  %v634_v9 = vld [vmem:[%s889_s1 + $0x58] sm:$0xff]  ;;  %v633_v11 = vld [vmem:[%s889_s1 + $0x50] sm:$0xff] }
   0x5   :  { %v624_v12 = vld [vmem:[%s889_s1 + $0x8] sm:$0xff]  ;;  %v623_v14 = vld [vmem:[%s889_s1] sm:$0xff]  ;;  %v489_v28 = vld [vmem:[%s890_s0 + $0x10] sm:$0xf] }
   0x6   :  { %275 = vmatpush.bf16.msra.mxu0 %v629_v2  ;;  %640 = vmatpush.bf16.msra.mxu2 %v629_v2  ;;  %v632_v13 = vld [vmem:[%s889_s1 + $0x48] sm:$0xff]  ;;  %v631_v15 = vld [vmem:[%s889_s1 + $0x40] sm:$0xff]  ;;  %v610_v29 = vld [vmem:[%s890_s0 + $0x14] sm:$0xf0] }
   0x7   :  { %324 = vmatpush.bf16.msra.mxu1 %v637_v3  ;;  %648 = vmatpush.bf16.msra.mxu3 %v637_v3  ;;  %v481_v16 = vld [vmem:[%s890_s0] sm:$0xf]  ;;  %v608_v17 = vld [vmem:[%s890_s0 + $0x4] sm:$0xf0]  ;;  %v607_v20 = vld [vmem:[%s890_s0 + $0x4] sm:$0xf]  ;;  %v490_v36 = vor.u32 %v610_v29, %v489_v28 }
   0x8   :  { %v513_v18 = vld [vmem:[%s890_s0 + $0x40] sm:$0xf]  ;;  %v616_v19 = vld [vmem:[%s890_s0 + $0x44] sm:$0xf0]  ;;  %v483_v21 = vld [vmem:[%s890_s0 + $0x8] sm:$0xf0]  ;;  %v482_v24 = vor.u32 %v608_v17, %v481_v16 }
   0x9   :  { %v615_v22 = vld [vmem:[%s890_s0 + $0x44] sm:$0xf]  ;;  %v515_v23 = vld [vmem:[%s890_s0 + $0x48] sm:$0xf0]  ;;  %v514_v25 = vor.u32 %v616_v19, %v513_v18  ;;  %v486_v26 = vor.u32 %v607_v20, %v483_v21  ;;  %v521_v30 = vld [vmem:[%s890_s0 + $0x50] sm:$0xf] }
   0xa   :  { %276 = vmatpush.bf16.msra.mxu0 %v628_v4  ;;  %641 = vmatpush.bf16.msra.mxu2 %v628_v4  ;;  %v518_v27 = vor.u32 %v615_v22, %v515_v23  ;;  %v618_v31 = vld [vmem:[%s890_s0 + $0x54] sm:$0xf0]  ;;  %v609_v32 = vld [vmem:[%s890_s0 + $0x14] sm:$0xf]  ;;  %v491_v33 = vld [vmem:[%s890_s0 + $0x18] sm:$0xf0] }
   0xb   :  { %325 = vmatpush.bf16.msra.mxu1 %v636_v5  ;;  %649 = vmatpush.bf16.msra.mxu3 %v636_v5  ;;  %v617_v34 = vld [vmem:[%s890_s0 + $0x54] sm:$0xf]  ;;  %v523_v35 = vld [vmem:[%s890_s0 + $0x58] sm:$0xf0]  ;;  %v522_v37 = vor.u32 %v618_v31, %v521_v30  ;;  %v494_v38 = vor.u32 %v609_v32, %v491_v33  ;;  %v497_v40 = vld [vmem:[%s890_s0 + $0x20] sm:$0xf] }
   0xc   :  { %v526_v39 = vor.u32 %v617_v34, %v523_v35  ;;  %v612_v41 = vld [vmem:[%s890_s0 + $0x24] sm:$0xf0]  ;;  %v529_v42 = vld [vmem:[%s890_s0 + $0x60] sm:$0xf]  ;;  %v611_v44 = vld [vmem:[%s890_s0 + $0x24] sm:$0xf] }
   0xd   :  { %v620_v43 = vld [vmem:[%s890_s0 + $0x64] sm:$0xf0]  ;;  %v499_v45 = vld [vmem:[%s890_s0 + $0x28] sm:$0xf0]  ;;  %v619_v46 = vld [vmem:[%s890_s0 + $0x64] sm:$0xf]  ;;  %v498_v48 = vor.u32 %v612_v41, %v497_v40 }
   0xe   :  { %277 = vmatpush.bf16.msra.mxu0 %v627_v6  ;;  %642 = vmatpush.bf16.msra.mxu2 %v627_v6  ;;  %v531_v47 = vld [vmem:[%s890_s0 + $0x68] sm:$0xf0]  ;;  %v530_v49 = vor.u32 %v620_v43, %v529_v42  ;;  %v502_v50 = vor.u32 %v611_v44, %v499_v45  ;;  %v505_v52 = vld [vmem:[%s890_s0 + $0x30] sm:$0xf]  ;;  %v614_v53 = vld [vmem:[%s890_s0 + $0x34] sm:$0xf0] }
   0xf   :  { %326 = vmatpush.bf16.msra.mxu1 %v635_v7  ;;  %650 = vmatpush.bf16.msra.mxu3 %v635_v7  ;;  %v534_v51 = vor.u32 %v619_v46, %v531_v47  ;;  %v537_v54 = vld [vmem:[%s890_s0 + $0x70] sm:$0xf]  ;;  %v622_v55 = vld [vmem:[%s890_s0 + $0x74] sm:$0xf0]  ;;  %v613_v56 = vld [vmem:[%s890_s0 + $0x34] sm:$0xf]  ;;  %v506_v60 = vor.u32 %v614_v53, %v505_v52 }
  0x10   :  { %v507_v57 = vld [vmem:[%s890_s0 + $0x38] sm:$0xf0]  ;;  %v621_v58 = vld [vmem:[%s890_s0 + $0x74] sm:$0xf]  ;;  %v538_v61 = vor.u32 %v622_v55, %v537_v54  ;;  %v823_v1 = vld [vmem:[%s891_s2] ss:$0 sm:$0xff] }
  0x11   :  { %v539_v59 = vld [vmem:[%s890_s0 + $0x78] sm:$0xf0]  ;;  %v510_v62 = vor.u32 %v613_v56, %v507_v57 }
  0x12   :  { %278 = vmatpush.bf16.msra.mxu0 %v626_v8  ;;  %643 = vmatpush.bf16.msra.mxu2 %v626_v8  ;;  %v542_v63 = vor.u32 %v621_v58, %v539_v59 }
  0x13   :  { %327 = vmatpush.bf16.msra.mxu1 %v634_v9  ;;  %651 = vmatpush.bf16.msra.mxu3 %v634_v9 }
  0x16   :  { %279 = vmatpush.bf16.msra.mxu0 %v625_v10  ;;  %644 = vmatpush.bf16.msra.mxu2 %v625_v10 }
  0x17   :  { %328 = vmatpush.bf16.msra.mxu1 %v633_v11  ;;  %652 = vmatpush.bf16.msra.mxu3 %v633_v11 }
  0x1a   :  { %280 = vmatpush.bf16.msra.mxu0 %v624_v12  ;;  %645 = vmatpush.bf16.msra.mxu2 %v624_v12 }
  0x1b   :  { %329 = vmatpush.bf16.msra.mxu1 %v632_v13  ;;  %653 = vmatpush.bf16.msra.mxu3 %v632_v13 }
  0x1e   :  { %281 = vmatpush.bf16.msra.mxu0 %v623_v14  ;;  %646 = vmatpush.bf16.msra.mxu2 %v623_v14 }
  0x1f   :  { %330 = vmatpush.bf16.msra.mxu1 %v631_v15  ;;  %654 = vmatpush.bf16.msra.mxu3 %v631_v15 }
  0x21   :  { %282 = vmatmul.bf16.vlgmr.msra.gmra.mxu0 %v482_v24  ;;  %302 = vmatmul.bf16.vlgmr.msra.gmra.mxu2 %v514_v25 }
  0x22   :  { %331 = vmatmul.bf16.vlgmr.msra.gmra.mxu1 %v486_v26  ;;  %351 = vmatmul.bf16.vlgmr.msra.gmra.mxu3 %v518_v27 }
  0x31   :  { %287 = vmatmul.bf16.gmra.mxu0 %v490_v36  ;;  %307 = vmatmul.bf16.gmra.mxu2 %v522_v37 }
  0x32   :  { %336 = vmatmul.bf16.gmra.mxu1 %v494_v38  ;;  %356 = vmatmul.bf16.gmra.mxu3 %v526_v39 }
  0x41   :  { %292 = vmatmul.bf16.gmra.mxu0 %v498_v48  ;;  %312 = vmatmul.bf16.gmra.mxu2 %v530_v49 }
  0x42   :  { %341 = vmatmul.bf16.gmra.mxu1 %v502_v50  ;;  %361 = vmatmul.bf16.gmra.mxu3 %v534_v51 }
  0x51   :  { %297 = vmatmul.bf16.gmra.mxu0 %v506_v60  ;;  %317 = vmatmul.bf16.gmra.mxu2 %v538_v61 }
  0x52   :  { %346 = vmatmul.bf16.gmra.mxu1 %v510_v62  ;;  %366 = vmatmul.bf16.gmra.mxu3 %v542_v63 }
  0x9e   :  { %v283_v0 = vpop.f32.mrf.mxu0 }
  0x9f   :  { %v332_v2 = vpop.f32.mrf.mxu1 }
  0xa0   :  { %v333_v3 = vadd.f32 %v332_v2, %v283_v0 }
  0xa2   :  { %v427_v4 = vadd.f32 %v823_v1, %v333_v3 }
  0xa4   :  { %v443_v5 = vmax.f32 %v427_v4, 0.0  ;;  %v303_v6 = vpop.f32.mrf.mxu2 }
  0xa5   :  { %v352_v7 = vpop.f32.mrf.mxu3 }
  0xa6   :  { %459 = vst [vmem:[%s892_s3] sm:$0xff] %v443_v5  ;;  %v353_v8 = vadd.f32 %v352_v7, %v303_v6  ;;  %v285_v9 = vpop.f32.mrf.mxu0 }
  0xa7   :  { %v334_v10 = vpop.f32.mrf.mxu1 }
  0xa8   :  { %v435_v11 = vadd.f32 %v823_v1, %v353_v8  ;;  %v335_v12 = vadd.f32 %v334_v10, %v285_v9 }
  0xaa   :  { %v451_v13 = vmax.f32 %v435_v11, 0.0  ;;  %v428_v14 = vadd.f32 %v823_v1, %v335_v12 }
  0xac   :  { %467 = vst [vmem:[%s892_s3 + $0x40] sm:$0xff] %v451_v13  ;;  %v444_v15 = vmax.f32 %v428_v14, 0.0  ;;  %v305_v16 = vpop.f32.mrf.mxu2 }
  0xad   :  { %v354_v17 = vpop.f32.mrf.mxu3 }
  0xae   :  { %460 = vst [vmem:[%s892_s3 + $0x8] sm:$0xff] %v444_v15  ;;  %v355_v18 = vadd.f32 %v354_v17, %v305_v16  ;;  %v288_v19 = vpop.f32.mrf.mxu0 }
  0xaf   :  { %v337_v20 = vpop.f32.mrf.mxu1 }
  0xb0   :  { %v436_v21 = vadd.f32 %v823_v1, %v355_v18  ;;  %v338_v22 = vadd.f32 %v337_v20, %v288_v19 }
  0xb2   :  { %v452_v23 = vmax.f32 %v436_v21, 0.0  ;;  %v429_v24 = vadd.f32 %v823_v1, %v338_v22 }
  0xb4   :  { %468 = vst [vmem:[%s892_s3 + $0x48] sm:$0xff] %v452_v23  ;;  %v445_v25 = vmax.f32 %v429_v24, 0.0  ;;  %v308_v26 = vpop.f32.mrf.mxu2 }
  0xb5   :  { %v357_v27 = vpop.f32.mrf.mxu3 }
  0xb6   :  { %461 = vst [vmem:[%s892_s3 + $0x10] sm:$0xff] %v445_v25  ;;  %v358_v28 = vadd.f32 %v357_v27, %v308_v26  ;;  %v290_v29 = vpop.f32.mrf.mxu0 }
  0xb7   :  { %v339_v30 = vpop.f32.mrf.mxu1 }
  0xb8   :  { %v437_v31 = vadd.f32 %v823_v1, %v358_v28  ;;  %v340_v32 = vadd.f32 %v339_v30, %v290_v29 }
  0xba   :  { %v453_v33 = vmax.f32 %v437_v31, 0.0  ;;  %v430_v34 = vadd.f32 %v823_v1, %v340_v32 }
  0xbc   :  { %469 = vst [vmem:[%s892_s3 + $0x50] sm:$0xff] %v453_v33  ;;  %v446_v35 = vmax.f32 %v430_v34, 0.0  ;;  %v310_v36 = vpop.f32.mrf.mxu2 }
  0xbd   :  { %v359_v37 = vpop.f32.mrf.mxu3 }
  0xbe   :  { %462 = vst [vmem:[%s892_s3 + $0x18] sm:$0xff] %v446_v35  ;;  %v360_v38 = vadd.f32 %v359_v37, %v310_v36  ;;  %v293_v39 = vpop.f32.mrf.mxu0 }
  0xbf   :  { %v342_v40 = vpop.f32.mrf.mxu1 }
  0xc0   :  { %v438_v41 = vadd.f32 %v823_v1, %v360_v38  ;;  %v343_v42 = vadd.f32 %v342_v40, %v293_v39 }
  0xc2   :  { %v454_v43 = vmax.f32 %v438_v41, 0.0  ;;  %v431_v44 = vadd.f32 %v823_v1, %v343_v42 }
  0xc4   :  { %470 = vst [vmem:[%s892_s3 + $0x58] sm:$0xff] %v454_v43  ;;  %v447_v45 = vmax.f32 %v431_v44, 0.0  ;;  %v313_v46 = vpop.f32.mrf.mxu2 }
  0xc5   :  { %v362_v47 = vpop.f32.mrf.mxu3 }
  0xc6   :  { %463 = vst [vmem:[%s892_s3 + $0x20] sm:$0xff] %v447_v45  ;;  %v363_v48 = vadd.f32 %v362_v47, %v313_v46  ;;  %v295_v49 = vpop.f32.mrf.mxu0 }
  0xc7   :  { %v344_v50 = vpop.f32.mrf.mxu1 }
  0xc8   :  { %v439_v51 = vadd.f32 %v823_v1, %v363_v48  ;;  %v345_v52 = vadd.f32 %v344_v50, %v295_v49 }
  0xca   :  { %v455_v53 = vmax.f32 %v439_v51, 0.0  ;;  %v432_v54 = vadd.f32 %v823_v1, %v345_v52 }
  0xcc   :  { %471 = vst [vmem:[%s892_s3 + $0x60] sm:$0xff] %v455_v53  ;;  %v448_v55 = vmax.f32 %v432_v54, 0.0  ;;  %v315_v56 = vpop.f32.mrf.mxu2 }
  0xcd   :  { %v364_v57 = vpop.f32.mrf.mxu3 }
  0xce   :  { %464 = vst [vmem:[%s892_s3 + $0x28] sm:$0xff] %v448_v55  ;;  %v365_v58 = vadd.f32 %v364_v57, %v315_v56  ;;  %v298_v59 = vpop.f32.mrf.mxu0 }
  0xcf   :  { %v347_v60 = vpop.f32.mrf.mxu1 }
  0xd0   :  { %v440_v61 = vadd.f32 %v823_v1, %v365_v58  ;;  %v348_v62 = vadd.f32 %v347_v60, %v298_v59 }
  0xd2   :  { %v456_v63 = vmax.f32 %v440_v61, 0.0  ;;  %v433_v0 = vadd.f32 %v823_v1, %v348_v62 }
  0xd4   :  { %472 = vst [vmem:[%s892_s3 + $0x68] sm:$0xff] %v456_v63  ;;  %v449_v2 = vmax.f32 %v433_v0, 0.0  ;;  %v318_v3 = vpop.f32.mrf.mxu2 }
  0xd5   :  { %v367_v4 = vpop.f32.mrf.mxu3 }
  0xd6   :  { %465 = vst [vmem:[%s892_s3 + $0x30] sm:$0xff] %v449_v2  ;;  %v368_v5 = vadd.f32 %v367_v4, %v318_v3  ;;  %v300_v6 = vpop.f32.mrf.mxu0 }
  0xd7   :  { %v349_v7 = vpop.f32.mrf.mxu1 }
  0xd8   :  { %v441_v8 = vadd.f32 %v823_v1, %v368_v5  ;;  %v350_v9 = vadd.f32 %v349_v7, %v300_v6 }
  0xda   :  { %v457_v10 = vmax.f32 %v441_v8, 0.0  ;;  %v434_v11 = vadd.f32 %v823_v1, %v350_v9 }
  0xdc   :  { %473 = vst [vmem:[%s892_s3 + $0x70] sm:$0xff] %v457_v10  ;;  %v450_v12 = vmax.f32 %v434_v11, 0.0  ;;  %v320_v13 = vpop.f32.mrf.mxu2 }
  0xdd   :  { %v369_v14 = vpop.f32.mrf.mxu3 }
  0xde   :  { %466 = vst [vmem:[%s892_s3 + $0x38] sm:$0xff] %v450_v12  ;;  %v370_v15 = vadd.f32 %v369_v14, %v320_v13 }
  0xe0   :  { %v442_v16 = vadd.f32 %v823_v1, %v370_v15 }
  0xe2   :  { %v458_v17 = vmax.f32 %v442_v16, 0.0 }
  0xe4   :  { %474 = vst [vmem:[%s892_s3 + $0x78] sm:$0xff] %v458_v17 }

</bundles_post_ra>
